<compile_context>
chip_gen: v5e
topology: v5e:2x2
jax: 0.10.0
libtpu: 0.0.40
codegen_flags: <defaults>
</compile_context>

<pallas_src>
import jax
import jax.numpy as jnp
from jax import lax
from jax.experimental import pallas as pl
from jax.experimental.pallas import tpu as pltpu

# ---------------- configuration (small synthetic shapes) ----------------
BATCH = 2
IN_CH = 3
IMG_H = IMG_W = 16
PATCH = 4                      # backbone patchify conv kernel = stride = 4
BACKBONE_CH = 16
HIDDEN = 32                    # transformer d_model
FFN = 64
NUM_QUERIES = 8
NUM_CLASSES = 4                # class head emits NUM_CLASSES + 1 (no-object)

SEQ = (IMG_H // PATCH) * (IMG_W // PATCH)      # 16 encoder tokens
PPC = PATCH * PATCH * IN_CH                    # 48 patch features
OUT_W = 128                                    # lane-dense output slab width
PARAM_LANES = 128                              # lane width of the parameter slabs

MXU_DTYPE = jnp.bfloat16                       # matmul operand dtype (f32 accumulation)

# ---------------- static parameter-slab layout (name -> (rows, cols)) ----------------
_W_SHAPES = [                                      # bf16 matmul weights
    ("w_patch", (PPC, BACKBONE_CH)),
    ("w_proj",  (BACKBONE_CH, HIDDEN)),
    ("enc_qkv", (HIDDEN, 3 * HIDDEN)),             # [Wq*scale | Wk | Wv]
    ("enc_wo",  (HIDDEN, HIDDEN)),
    ("enc_w1",  (HIDDEN, FFN)),
    ("enc_w2",  (FFN, HIDDEN)),
    ("dec_kv",  (HIDDEN, 2 * HIDDEN)),             # [Wk | Wv] of cross-attention
    ("dec_wo",  (HIDDEN, HIDDEN)),
    ("dec_w1",  (HIDDEN, FFN)),
    ("dec_w2",  (FFN, HIDDEN)),
    ("head_w",  (HIDDEN, NUM_CLASSES + 1 + HIDDEN)),  # [cls_w | bbox_w1]
    ("bbox_w2", (HIDDEN, HIDDEN)),
    ("bbox_w3", (HIDDEN, 4)),
]

_C_SHAPES = [                                      # f32 biases / LN / hoisted constants
    ("b_patch",   (1, BACKBONE_CH)),
    ("b_proj",    (1, HIDDEN)),
    ("enc_qkv_c", (SEQ, 3 * HIDDEN)),              # [pos@Wq*s + bq*s | pos@Wk + bk | bv]
    ("enc_bo",    (1, HIDDEN)),
    ("enc_ln1_g", (1, HIDDEN)), ("enc_ln1_b", (1, HIDDEN)),
    ("enc_b1",    (1, FFN)),    ("enc_b2",    (1, HIDDEN)),
    ("enc_ln2_g", (1, HIDDEN)), ("enc_ln2_b", (1, HIDDEN)),
    ("dec_q",     (NUM_QUERIES, HIDDEN)),          # constant cross-attn queries
    ("dec_kv_c",  (SEQ, 2 * HIDDEN)),              # [pos@Wk + bk | bv]
    ("dec_bo",    (1, HIDDEN)),
    ("tgt0",      (1, HIDDEN)),                    # hoisted decoder self-attn block
    ("dec_ln2_g", (1, HIDDEN)), ("dec_ln2_b", (1, HIDDEN)),
    ("dec_b1",    (1, FFN)),    ("dec_b2",    (1, HIDDEN)),
    ("dec_ln3_g", (1, HIDDEN)), ("dec_ln3_b", (1, HIDDEN)),
    ("head_b",    (1, NUM_CLASSES + 1 + HIDDEN)),
    ("bbox_b2",   (1, HIDDEN)), ("bbox_b3", (1, 4)),
]


def _make_layout(shapes, row_align):
    """Static row offsets into a [total_rows, 128] slab; offsets kept aligned."""
    off, r = {}, 0
    for name, (rows, cols) in shapes:
        assert cols <= PARAM_LANES
        off[name] = (r, rows, cols)
        r += -(-rows // row_align) * row_align
    return off, r


_W_OFF, _W_ROWS = _make_layout(_W_SHAPES, 16)      # bf16 packs 16 rows / vreg
_C_OFF, _C_ROWS = _make_layout(_C_SHAPES, 8)       # f32  packs  8 rows / vreg


# ============================= fused Pallas kernel =============================

def _detr_fused_kernel(size_ref, patches_ref, w_ref, c_ref, out_ref):
    f32 = jnp.float32
    D, Q, S, C1 = HIDDEN, NUM_QUERIES, SEQ, NUM_CLASSES + 1

    def wv(name):                                   # static bf16 weight view
        r, rows, cols = _W_OFF[name]
        return w_ref[r:r + rows, :cols]

    def cv(name):                                   # static f32 constant view
        r, rows, cols = _C_OFF[name]
        return c_ref[r:r + rows, :cols]

    def lin(x, wname, cname):
        return jnp.dot(x.astype(MXU_DTYPE), wv(wname),
                       preferred_element_type=f32) + cv(cname)

    def ln(x, gname, bname):
        mu = jnp.mean(x, axis=-1, keepdims=True)
        xm = x - mu
        var = jnp.mean(xm * xm, axis=-1, keepdims=True)
        return xm * lax.rsqrt(var + 1e-5) * cv(gname) + cv(bname)

    def attn(q, k, v):
        # scale is already folded into the q projection
        s = lax.dot_general(q.astype(MXU_DTYPE), k.astype(MXU_DTYPE),
                            (((1,), (1,)), ((), ())),       # q @ k^T, no transpose op
                            preferred_element_type=f32)
        s = s - jnp.max(s, axis=-1, keepdims=True)
        p = jnp.exp(s)
        p = p * pl.reciprocal(jnp.sum(p, axis=-1, keepdims=True), approx=True)
        return jnp.dot(p.astype(MXU_DTYPE), v.astype(MXU_DTYPE),
                       preferred_element_type=f32)

    # ---- backbone: patchify conv + ReLU, then 1x1 input_proj ----
    x = patches_ref[...].astype(f32)                                   # [S, 48]
    feat = jnp.maximum(lin(x, "w_patch", "b_patch"), 0.0)              # [S, 16]
    src = lin(feat, "w_proj", "b_proj")                                # [S, D]

    # ---- encoder layer (post-norm); q/k/v fused into one [D,3D] matmul,
    #      positional-embedding projections folded into the additive constant ----
    qkv = lin(src, "enc_qkv", "enc_qkv_c")                             # [S, 3D]
    q, k, v = qkv[:, :D], qkv[:, D:2 * D], qkv[:, 2 * D:]
    a = attn(q, k, v)
    src = src + lin(a, "enc_wo", "enc_bo")
    src = ln(src, "enc_ln1_g", "enc_ln1_b")
    ff = lin(jnp.maximum(lin(src, "enc_w1", "enc_b1"), 0.0), "enc_w2", "enc_b2")
    memory = ln(src + ff, "enc_ln2_g", "enc_ln2_b")                    # [S, D]

    # ---- decoder layer (post-norm) ----
    # Self-attention on tgt = zeros is parameter-only -> hoisted constant tgt0.
    # Cross-attn q = (tgt0 + qpos) @ Wq is parameter-only -> hoisted constant dec_q.
    # Cross-attn k/v fused into one [D,2D] matmul on memory (pos@Wk folded).
    kvm = lin(memory, "dec_kv", "dec_kv_c")                            # [S, 2D]
    k, v = kvm[:, :D], kvm[:, D:]
    a = attn(cv("dec_q"), k, v)                                        # [Q, D]
    tgt = cv("tgt0") + lin(a, "dec_wo", "dec_bo")                      # broadcast add
    tgt = ln(tgt, "dec_ln2_g", "dec_ln2_b")
    ff = lin(jnp.maximum(lin(tgt, "dec_w1", "dec_b1"), 0.0), "dec_w2", "dec_b2")
    hs = ln(tgt + ff, "dec_ln3_g", "dec_ln3_b")                        # [Q, D]

    # ---- heads: class head + first bbox-MLP layer fused into one matmul ----
    ho = lin(hs, "head_w", "head_b")                                   # [Q, C+1+D]
    logits = ho[:, :C1]                                                # [Q, C+1]
    h = jnp.maximum(ho[:, C1:], 0.0)                                   # [Q, D]
    h = jnp.maximum(lin(h, "bbox_w2", "bbox_b2"), 0.0)
    z = lin(h, "bbox_w3", "bbox_b3")                                   # [Q, 4]
    boxes = 1.0 / (1.0 + jnp.exp(-z))                                  # sigmoid, cxcywh

    # ---- DETR PostProcess (image 0 only); exact softmax for fidelity ----
    m = jnp.max(logits, axis=-1, keepdims=True)
    e = jnp.exp(logits - m)
    prob = e / jnp.sum(e, axis=-1, keepdims=True)
    cls_prob = prob[:, :NUM_CLASSES]                                   # drop no-object
    scores = jnp.max(cls_prob, axis=-1, keepdims=True)                 # [Q, 1]
    iota = lax.broadcasted_iota(jnp.int32, cls_prob.shape, 1)
    labels = jnp.min(jnp.where(cls_prob == scores, iota, jnp.int32(10 ** 6)),
                     axis=-1, keepdims=True).astype(f32)               # first argmax

    img_h = size_ref[0]
    img_w = size_ref[1]
    cx, cy, w, hh = boxes[:, 0:1], boxes[:, 1:2], boxes[:, 2:3], boxes[:, 3:4]
    x0 = (cx - 0.5 * w) * img_w
    y0 = (cy - 0.5 * hh) * img_h
    x1 = (cx + 0.5 * w) * img_w
    y1 = (cy + 0.5 * hh) * img_h

    # lane-dense output slab: [score, x0, y0, x1, y1, label, 0...]  -> [Q, 128]
    out_ref[...] = jnp.concatenate(
        [scores, x0, y0, x1, y1, labels, jnp.zeros((Q, OUT_W - 6), f32)], axis=-1)


# ============================= wrapper (glue + kernel) =============================

def detr_wrapper_forward(wslab, cslab, x, img_size):
    """Mirrors DETRWrapper.forward: returns (scores, labels, boxes) for image 0."""
    B, C, H, W = x.shape
    P, Q = PATCH, NUM_QUERIES

    # Patch extraction glue (image 0 only; no cross-image interaction in the model).
    # allow_input_fusion lets XLA fuse this producer into the pallas custom call.
    x0 = jnp.transpose(x[0], (1, 2, 0))                                  # CHW -> HWC
    x0 = x0.reshape(H // P, P, W // P, P, C)
    patches = jnp.transpose(x0, (0, 2, 1, 3, 4)).reshape((H // P) * (W // P), P * P * C)

    size0 = img_size[0].astype(jnp.float32)                              # (h, w) of image 0

    out = pl.pallas_call(
        _detr_fused_kernel,
        out_shape=jax.ShapeDtypeStruct((Q, OUT_W), jnp.float32),
        in_specs=[
            pl.BlockSpec(memory_space=pltpu.MemorySpace.SMEM),           # (h, w) scalars
            pl.BlockSpec(memory_space=pltpu.MemorySpace.VMEM),           # patches [S, 48]
            pl.BlockSpec(memory_space=pltpu.MemorySpace.VMEM),           # bf16 weight slab
            pl.BlockSpec(memory_space=pltpu.MemorySpace.VMEM),           # f32 const slab
        ],
        out_specs=pl.BlockSpec(memory_space=pltpu.MemorySpace.VMEM),
        compiler_params=pltpu.CompilerParams(
            allow_input_fusion=[False, True, False, False]),
    )(size0, patches, wslab, cslab)

    scores = out[:, 0]
    boxes = out[:, 1:5]
    labels = out[:, 5].astype(jnp.int32)
    return scores, labels, boxes


# ============================= parameter init + packing =============================

def _init_params(key):
    keys = iter(jax.random.split(key, 96))

    def rnd(shape):
        scale = 1.0 / float(shape[0]) ** 0.5
        return jax.random.normal(next(keys), shape, jnp.float32) * scale

    def attn_block(D):
        return dict(wq=rnd((D, D)), bq=jnp.zeros((D,), jnp.float32),
                    wk=rnd((D, D)), bk=jnp.zeros((D,), jnp.float32),
                    wv=rnd((D, D)), bv=jnp.zeros((D,), jnp.float32),
                    wo=rnd((D, D)), bo=jnp.zeros((D,), jnp.float32))

    D, F = HIDDEN, FFN
    return {
        "w_patch": rnd((PPC, BACKBONE_CH)), "b_patch": jnp.zeros((BACKBONE_CH,), jnp.float32),
        "w_proj": rnd((BACKBONE_CH, D)), "b_proj": jnp.zeros((D,), jnp.float32),
        "pos_embed": rnd((SEQ, D)),
        "query_embed": rnd((NUM_QUERIES, D)),
        "enc_attn": attn_block(D),
        "enc_ln1_g": jnp.ones((D,), jnp.float32), "enc_ln1_b": jnp.zeros((D,), jnp.float32),
        "enc_w1": rnd((D, F)), "enc_b1": jnp.zeros((F,), jnp.float32),
        "enc_w2": rnd((F, D)), "enc_b2": jnp.zeros((D,), jnp.float32),
        "enc_ln2_g": jnp.ones((D,), jnp.float32), "enc_ln2_b": jnp.zeros((D,), jnp.float32),
        "dec_self": attn_block(D),
        "dec_ln1_g": jnp.ones((D,), jnp.float32), "dec_ln1_b": jnp.zeros((D,), jnp.float32),
        "dec_cross": attn_block(D),
        "dec_ln2_g": jnp.ones((D,), jnp.float32), "dec_ln2_b": jnp.zeros((D,), jnp.float32),
        "dec_w1": rnd((D, F)), "dec_b1": jnp.zeros((F,), jnp.float32),
        "dec_w2": rnd((F, D)), "dec_b2": jnp.zeros((D,), jnp.float32),
        "dec_ln3_g": jnp.ones((D,), jnp.float32), "dec_ln3_b": jnp.zeros((D,), jnp.float32),
        "cls_w": rnd((D, NUM_CLASSES + 1)), "cls_b": jnp.zeros((NUM_CLASSES + 1,), jnp.float32),
        "bbox_w1": rnd((D, D)), "bbox_b1": jnp.zeros((D,), jnp.float32),
        "bbox_w2": rnd((D, D)), "bbox_b2": jnp.zeros((D,), jnp.float32),
        "bbox_w3": rnd((D, 4)), "bbox_b3": jnp.zeros((4,), jnp.float32),
    }


def _build_slab(entries, layout, total_rows, dtype):
    slab = jnp.zeros((total_rows, PARAM_LANES), dtype)
    for name, arr in entries.items():
        r, rows, cols = layout[name]
        a = jnp.asarray(arr, jnp.float32)
        if a.ndim == 1:
            a = a.reshape(1, -1)
        assert a.shape == (rows, cols), (name, a.shape, (rows, cols))
        slab = slab.at[r:r + rows, :cols].set(a.astype(dtype))
    return slab


def _pack_params(p):
    """One-time host-side packing / hoisting:
      * all parameter-only math (tgt0, dec_q, pos projections, attention scale) is
        precomputed here, so the kernel's critical path has fewer serial MXU ops;
      * matmul weights are concatenated (enc q/k/v, dec k/v, cls|bbox1) and packed
        into a single bf16 [_W_ROWS, 128] slab;
      * biases / LN params / hoisted constants go into a single f32 [_C_ROWS, 128] slab.
    """
    D = HIDDEN
    scale = 1.0 / float(D) ** 0.5
    ea, ds, dc = p["enc_attn"], p["dec_self"], p["dec_cross"]
    pos, qpos = p["pos_embed"], p["query_embed"]

    # decoder self-attn on tgt = 0:  every v row = bv  ->  attn out rows = bv
    #   -> block output rows = bv @ wo + bo ; residual (0 +) and layernorm1 -> tgt0.
    c0 = ds["bv"] @ ds["wo"] + ds["bo"]
    mu = jnp.mean(c0)
    var = jnp.mean(jnp.square(c0 - mu))
    tgt0 = (c0 - mu) * lax.rsqrt(var + 1e-5) * p["dec_ln1_g"] + p["dec_ln1_b"]   # [D]

    # encoder q/k/v fused; 1/sqrt(D) scale folded into the q projection;
    # pos-embedding contributions folded into an additive [S, 3D] constant.
    enc_wq_s = ea["wq"] * scale
    enc_bq_s = ea["bq"] * scale
    enc_qkv = jnp.concatenate([enc_wq_s, ea["wk"], ea["wv"]], axis=1)            # [D, 3D]
    enc_qkv_c = jnp.concatenate(
        [pos @ enc_wq_s + enc_bq_s,
         pos @ ea["wk"] + ea["bk"],
         jnp.broadcast_to(ea["bv"], (SEQ, D))], axis=1)                          # [S, 3D]

    # decoder cross-attn: q is fully parameter-constant (scale folded); k/v fused.
    dec_q = ((tgt0[None, :] + qpos) @ dc["wq"] + dc["bq"]) * scale               # [Q, D]
    dec_kv = jnp.concatenate([dc["wk"], dc["wv"]], axis=1)                       # [D, 2D]
    dec_kv_c = jnp.concatenate(
        [pos @ dc["wk"] + dc["bk"],
         jnp.broadcast_to(dc["bv"], (SEQ, D))], axis=1)                          # [S, 2D]

    # class head + first bbox-MLP layer fused into one weight.
    head_w = jnp.concatenate([p["cls_w"], p["bbox_w1"]], axis=1)                 # [D, C+1+D]
    head_b = jnp.concatenate([p["cls_b"], p["bbox_b1"]])

    weights = {
        "w_patch": p["w_patch"], "w_proj": p["w_proj"],
        "enc_qkv": enc_qkv, "enc_wo": ea["wo"],
        "enc_w1": p["enc_w1"], "enc_w2": p["enc_w2"],
        "dec_kv": dec_kv, "dec_wo": dc["wo"],
        "dec_w1": p["dec_w1"], "dec_w2": p["dec_w2"],
        "head_w": head_w, "bbox_w2": p["bbox_w2"], "bbox_w3": p["bbox_w3"],
    }
    consts = {
        "b_patch": p["b_patch"], "b_proj": p["b_proj"],
        "enc_qkv_c": enc_qkv_c, "enc_bo": ea["bo"],
        "enc_ln1_g": p["enc_ln1_g"], "enc_ln1_b": p["enc_ln1_b"],
        "enc_b1": p["enc_b1"], "enc_b2": p["enc_b2"],
        "enc_ln2_g": p["enc_ln2_g"], "enc_ln2_b": p["enc_ln2_b"],
        "dec_q": dec_q, "dec_kv_c": dec_kv_c, "dec_bo": dc["bo"], "tgt0": tgt0,
        "dec_ln2_g": p["dec_ln2_g"], "dec_ln2_b": p["dec_ln2_b"],
        "dec_b1": p["dec_b1"], "dec_b2": p["dec_b2"],
        "dec_ln3_g": p["dec_ln3_g"], "dec_ln3_b": p["dec_ln3_b"],
        "head_b": head_b, "bbox_b2": p["bbox_b2"], "bbox_b3": p["bbox_b3"],
    }

    wslab = _build_slab(weights, _W_OFF, _W_ROWS, MXU_DTYPE)       # bf16 weight slab
    cslab = _build_slab(consts, _C_OFF, _C_ROWS, jnp.float32)      # f32 constant slab
    return wslab, cslab


# TODO(synk): torch.quantization.quantize_dynamic / torch.jit tracing concerns have no
# Pallas equivalent; matmuls run in bf16 with f32 accumulation, everything else in f32.

if __name__ == "__main__":
    key = jax.random.PRNGKey(0)
    kx, _ = jax.random.split(key)
    x = jax.random.normal(kx, (BATCH, IN_CH, IMG_H, IMG_W), jnp.float32)   # NCHW, like PyTorch
    # imgSize: per-image (img_h, img_w) used by the DETR PostProcess scale factor
    img_size = jnp.array([[480.0, 640.0], [320.0, 320.0]], jnp.float32)

    params = _init_params(jax.random.PRNGKey(42))
    wslab, cslab = _pack_params(params)          # one-time packing / hoisting (host side)

    fwd = jax.jit(detr_wrapper_forward)
    scores, labels, boxes = fwd(wslab, cslab, x, img_size)
    jax.block_until_ready((scores, labels, boxes))

    assert scores.shape == (NUM_QUERIES,) and scores.dtype == jnp.float32
    assert labels.shape == (NUM_QUERIES,) and labels.dtype == jnp.int32
    assert boxes.shape == (NUM_QUERIES, 4) and boxes.dtype == jnp.float32
    assert bool(jnp.all(jnp.isfinite(scores))) and bool(jnp.all(jnp.isfinite(boxes)))
    assert bool(jnp.all((labels >= 0) & (labels < NUM_CLASSES)))
    print("KERNEL_OK")
</pallas_src>

<mosaic_0001>
module attributes {stable_mosaic.version = 11 : i64} {
  func.func @_detr_fused_kernel(%arg0: memref<2xf32, #tpu.memory_space<smem>>, %arg1: memref<16x48xf32, #tpu.memory_space<vmem>>, %arg2: memref<480x128xbf16, #tpu.memory_space<vmem>>, %arg3: memref<200x128xf32, #tpu.memory_space<vmem>>, %arg4: memref<8x128xf32, #tpu.memory_space<vmem>>) attributes {dimension_semantics = [], scalar_prefetch = 0 : i64, scratch_operands = 0 : i64, tpu.core_type = #tpu.core_type<tc>} {
    %c0 = arith.constant 0 : index
    %c0_0 = arith.constant 0 : index
    %0 = vector.load %arg1[%c0, %c0_0] : memref<16x48xf32, #tpu.memory_space<vmem>>, vector<16x48xf32>
    %1 = arith.truncf %0 : vector<16x48xf32> to vector<16x48xbf16>
    %c0_1 = arith.constant 0 : index
    %c0_2 = arith.constant 0 : index
    %2 = vector.load %arg2[%c0_1, %c0_2] : memref<480x128xbf16, #tpu.memory_space<vmem>>, vector<48x16xbf16>
    %cst = arith.constant dense<0.000000e+00> : vector<16x16xf32>
    %3 = tpu.matmul %1, %2, %cst {dimension_numbers = #tpu.dot_dimension_numbers<[1], [0], [0], [1], [0, 0, 1, 1], [], []>} : vector<16x48xbf16>, vector<48x16xbf16>, vector<16x16xf32> -> vector<16x16xf32>
    %c0_3 = arith.constant 0 : index
    %c0_4 = arith.constant 0 : index
    %4 = vector.load %arg3[%c0_3, %c0_4] : memref<200x128xf32, #tpu.memory_space<vmem>>, vector<1x16xf32>
    %5 = vector.broadcast %4 : vector<1x16xf32> to vector<16x16xf32>
    %6 = arith.addf %3, %5 : vector<16x16xf32>
    %cst_5 = arith.constant 0.000000e+00 : f32
    %7 = vector.broadcast %cst_5 : f32 to vector<16x16xf32>
    %8 = arith.maximumf %6, %7 : vector<16x16xf32>
    %9 = arith.truncf %8 : vector<16x16xf32> to vector<16x16xbf16>
    %c48 = arith.constant 48 : index
    %c0_6 = arith.constant 0 : index
    %10 = vector.load %arg2[%c48, %c0_6] : memref<480x128xbf16, #tpu.memory_space<vmem>>, vector<16x32xbf16>
    %cst_7 = arith.constant dense<0.000000e+00> : vector<16x32xf32>
    %11 = tpu.matmul %9, %10, %cst_7 {dimension_numbers = #tpu.dot_dimension_numbers<[1], [0], [0], [1], [0, 0, 1, 1], [], []>} : vector<16x16xbf16>, vector<16x32xbf16>, vector<16x32xf32> -> vector<16x32xf32>
    %c8 = arith.constant 8 : index
    %c0_8 = arith.constant 0 : index
    %12 = vector.load %arg3[%c8, %c0_8] : memref<200x128xf32, #tpu.memory_space<vmem>>, vector<1x32xf32>
    %13 = vector.broadcast %12 : vector<1x32xf32> to vector<16x32xf32>
    %14 = arith.addf %11, %13 : vector<16x32xf32>
    %15 = arith.truncf %14 : vector<16x32xf32> to vector<16x32xbf16>
    %c64 = arith.constant 64 : index
    %c0_9 = arith.constant 0 : index
    %16 = vector.load %arg2[%c64, %c0_9] : memref<480x128xbf16, #tpu.memory_space<vmem>>, vector<32x96xbf16>
    %cst_10 = arith.constant dense<0.000000e+00> : vector<16x96xf32>
    %17 = tpu.matmul %15, %16, %cst_10 {dimension_numbers = #tpu.dot_dimension_numbers<[1], [0], [0], [1], [0, 0, 1, 1], [], []>} : vector<16x32xbf16>, vector<32x96xbf16>, vector<16x96xf32> -> vector<16x96xf32>
    %c16 = arith.constant 16 : index
    %c0_11 = arith.constant 0 : index
    %18 = vector.load %arg3[%c16, %c0_11] : memref<200x128xf32, #tpu.memory_space<vmem>>, vector<16x96xf32>
    %19 = arith.addf %17, %18 : vector<16x96xf32>
    %20 = vector.extract_strided_slice %19 {offsets = [0, 0], sizes = [16, 32], strides = [1, 1]} : vector<16x96xf32> to vector<16x32xf32>
    %21 = vector.extract_strided_slice %19 {offsets = [0, 32], sizes = [16, 32], strides = [1, 1]} : vector<16x96xf32> to vector<16x32xf32>
    %22 = vector.extract_strided_slice %19 {offsets = [0, 64], sizes = [16, 32], strides = [1, 1]} : vector<16x96xf32> to vector<16x32xf32>
    %23 = arith.truncf %20 : vector<16x32xf32> to vector<16x32xbf16>
    %24 = arith.truncf %21 : vector<16x32xf32> to vector<16x32xbf16>
    %cst_12 = arith.constant dense<0.000000e+00> : vector<16x16xf32>
    %25 = tpu.matmul %23, %24, %cst_12 {dimension_numbers = #tpu.dot_dimension_numbers<[1], [1], [0], [0], [0, 0, 1, 0], [], []>} : vector<16x32xbf16>, vector<16x32xbf16>, vector<16x16xf32> -> vector<16x16xf32>
    %cst_13 = arith.constant dense<0xFF800000> : vector<16xf32>
    %26 = vector.multi_reduction <maximumf>, %25, %cst_13 [1] : vector<16x16xf32> to vector<16xf32>
    %27 = vector.shape_cast %26 : vector<16xf32> to vector<16x1xf32>
    %28 = vector.broadcast %27 : vector<16x1xf32> to vector<16x16xf32>
    %29 = arith.subf %25, %28 : vector<16x16xf32>
    %30 = math.exp %29 : vector<16x16xf32>
    %cst_14 = arith.constant dense<0.000000e+00> : vector<16xf32>
    %31 = vector.multi_reduction <add>, %30, %cst_14 [1] : vector<16x16xf32> to vector<16xf32>
    %32 = vector.shape_cast %31 : vector<16xf32> to vector<16x1xf32>
    %33 = tpu.reciprocal %32 {approx = true} : vector<16x1xf32> -> vector<16x1xf32>
    %34 = vector.broadcast %33 : vector<16x1xf32> to vector<16x16xf32>
    %35 = arith.mulf %30, %34 : vector<16x16xf32>
    %36 = arith.truncf %35 : vector<16x16xf32> to vector<16x16xbf16>
    %37 = arith.truncf %22 : vector<16x32xf32> to vector<16x32xbf16>
    %cst_15 = arith.constant dense<0.000000e+00> : vector<16x32xf32>
    %38 = tpu.matmul %36, %37, %cst_15 {dimension_numbers = #tpu.dot_dimension_numbers<[1], [0], [0], [1], [0, 0, 1, 1], [], []>} : vector<16x16xbf16>, vector<16x32xbf16>, vector<16x32xf32> -> vector<16x32xf32>
    %39 = arith.truncf %38 : vector<16x32xf32> to vector<16x32xbf16>
    %c96 = arith.constant 96 : index
    %c0_16 = arith.constant 0 : index
    %40 = vector.load %arg2[%c96, %c0_16] : memref<480x128xbf16, #tpu.memory_space<vmem>>, vector<32x32xbf16>
    %cst_17 = arith.constant dense<0.000000e+00> : vector<16x32xf32>
    %41 = tpu.matmul %39, %40, %cst_17 {dimension_numbers = #tpu.dot_dimension_numbers<[1], [0], [0], [1], [0, 0, 1, 1], [], []>} : vector<16x32xbf16>, vector<32x32xbf16>, vector<16x32xf32> -> vector<16x32xf32>
    %c32 = arith.constant 32 : index
    %c0_18 = arith.constant 0 : index
    %42 = vector.load %arg3[%c32, %c0_18] : memref<200x128xf32, #tpu.memory_space<vmem>>, vector<1x32xf32>
    %43 = vector.broadcast %42 : vector<1x32xf32> to vector<16x32xf32>
    %44 = arith.addf %41, %43 : vector<16x32xf32>
    %45 = arith.addf %14, %44 : vector<16x32xf32>
    %cst_19 = arith.constant dense<0.000000e+00> : vector<16xf32>
    %46 = vector.multi_reduction <add>, %45, %cst_19 [1] : vector<16x32xf32> to vector<16xf32>
    %47 = vector.shape_cast %46 : vector<16xf32> to vector<16x1xf32>
    %cst_20 = arith.constant 3.200000e+01 : f32
    %48 = vector.broadcast %cst_20 : f32 to vector<16x1xf32>
    %49 = arith.divf %47, %48 : vector<16x1xf32>
    %50 = vector.broadcast %49 : vector<16x1xf32> to vector<16x32xf32>
    %51 = arith.subf %45, %50 : vector<16x32xf32>
    %52 = arith.mulf %51, %51 : vector<16x32xf32>
    %cst_21 = arith.constant dense<0.000000e+00> : vector<16xf32>
    %53 = vector.multi_reduction <add>, %52, %cst_21 [1] : vector<16x32xf32> to vector<16xf32>
    %54 = vector.shape_cast %53 : vector<16xf32> to vector<16x1xf32>
    %cst_22 = arith.constant 3.200000e+01 : f32
    %55 = vector.broadcast %cst_22 : f32 to vector<16x1xf32>
    %56 = arith.divf %54, %55 : vector<16x1xf32>
    %cst_23 = arith.constant 9.99999974E-6 : f32
    %57 = vector.broadcast %cst_23 : f32 to vector<16x1xf32>
    %58 = arith.addf %56, %57 : vector<16x1xf32>
    %59 = math.rsqrt %58 : vector<16x1xf32>
    %60 = vector.broadcast %59 : vector<16x1xf32> to vector<16x32xf32>
    %61 = arith.mulf %51, %60 : vector<16x32xf32>
    %c40 = arith.constant 40 : index
    %c0_24 = arith.constant 0 : index
    %62 = vector.load %arg3[%c40, %c0_24] : memref<200x128xf32, #tpu.memory_space<vmem>>, vector<1x32xf32>
    %63 = vector.broadcast %62 : vector<1x32xf32> to vector<16x32xf32>
    %64 = arith.mulf %61, %63 : vector<16x32xf32>
    %c48_25 = arith.constant 48 : index
    %c0_26 = arith.constant 0 : index
    %65 = vector.load %arg3[%c48_25, %c0_26] : memref<200x128xf32, #tpu.memory_space<vmem>>, vector<1x32xf32>
    %66 = vector.broadcast %65 : vector<1x32xf32> to vector<16x32xf32>
    %67 = arith.addf %64, %66 : vector<16x32xf32>
    %68 = arith.truncf %67 : vector<16x32xf32> to vector<16x32xbf16>
    %c128 = arith.constant 128 : index
    %c0_27 = arith.constant 0 : index
    %69 = vector.load %arg2[%c128, %c0_27] : memref<480x128xbf16, #tpu.memory_space<vmem>>, vector<32x64xbf16>
    %cst_28 = arith.constant dense<0.000000e+00> : vector<16x64xf32>
    %70 = tpu.matmul %68, %69, %cst_28 {dimension_numbers = #tpu.dot_dimension_numbers<[1], [0], [0], [1], [0, 0, 1, 1], [], []>} : vector<16x32xbf16>, vector<32x64xbf16>, vector<16x64xf32> -> vector<16x64xf32>
    %c56 = arith.constant 56 : index
    %c0_29 = arith.constant 0 : index
    %71 = vector.load %arg3[%c56, %c0_29] : memref<200x128xf32, #tpu.memory_space<vmem>>, vector<1x64xf32>
    %72 = vector.broadcast %71 : vector<1x64xf32> to vector<16x64xf32>
    %73 = arith.addf %70, %72 : vector<16x64xf32>
    %cst_30 = arith.constant 0.000000e+00 : f32
    %74 = vector.broadcast %cst_30 : f32 to vector<16x64xf32>
    %75 = arith.maximumf %73, %74 : vector<16x64xf32>
    %76 = arith.truncf %75 : vector<16x64xf32> to vector<16x64xbf16>
    %c160 = arith.constant 160 : index
    %c0_31 = arith.constant 0 : index
    %77 = vector.load %arg2[%c160, %c0_31] : memref<480x128xbf16, #tpu.memory_space<vmem>>, vector<64x32xbf16>
    %cst_32 = arith.constant dense<0.000000e+00> : vector<16x32xf32>
    %78 = tpu.matmul %76, %77, %cst_32 {dimension_numbers = #tpu.dot_dimension_numbers<[1], [0], [0], [1], [0, 0, 1, 1], [], []>} : vector<16x64xbf16>, vector<64x32xbf16>, vector<16x32xf32> -> vector<16x32xf32>
    %c64_33 = arith.constant 64 : index
    %c0_34 = arith.constant 0 : index
    %79 = vector.load %arg3[%c64_33, %c0_34] : memref<200x128xf32, #tpu.memory_space<vmem>>, vector<1x32xf32>
    %80 = vector.broadcast %79 : vector<1x32xf32> to vector<16x32xf32>
    %81 = arith.addf %78, %80 : vector<16x32xf32>
    %82 = arith.addf %67, %81 : vector<16x32xf32>
    %cst_35 = arith.constant dense<0.000000e+00> : vector<16xf32>
    %83 = vector.multi_reduction <add>, %82, %cst_35 [1] : vector<16x32xf32> to vector<16xf32>
    %84 = vector.shape_cast %83 : vector<16xf32> to vector<16x1xf32>
    %cst_36 = arith.constant 3.200000e+01 : f32
    %85 = vector.broadcast %cst_36 : f32 to vector<16x1xf32>
    %86 = arith.divf %84, %85 : vector<16x1xf32>
    %87 = vector.broadcast %86 : vector<16x1xf32> to vector<16x32xf32>
    %88 = arith.subf %82, %87 : vector<16x32xf32>
    %89 = arith.mulf %88, %88 : vector<16x32xf32>
    %cst_37 = arith.constant dense<0.000000e+00> : vector<16xf32>
    %90 = vector.multi_reduction <add>, %89, %cst_37 [1] : vector<16x32xf32> to vector<16xf32>
    %91 = vector.shape_cast %90 : vector<16xf32> to vector<16x1xf32>
    %cst_38 = arith.constant 3.200000e+01 : f32
    %92 = vector.broadcast %cst_38 : f32 to vector<16x1xf32>
    %93 = arith.divf %91, %92 : vector<16x1xf32>
    %cst_39 = arith.constant 9.99999974E-6 : f32
    %94 = vector.broadcast %cst_39 : f32 to vector<16x1xf32>
    %95 = arith.addf %93, %94 : vector<16x1xf32>
    %96 = math.rsqrt %95 : vector<16x1xf32>
    %97 = vector.broadcast %96 : vector<16x1xf32> to vector<16x32xf32>
    %98 = arith.mulf %88, %97 : vector<16x32xf32>
    %c72 = arith.constant 72 : index
    %c0_40 = arith.constant 0 : index
    %99 = vector.load %arg3[%c72, %c0_40] : memref<200x128xf32, #tpu.memory_space<vmem>>, vector<1x32xf32>
    %100 = vector.broadcast %99 : vector<1x32xf32> to vector<16x32xf32>
    %101 = arith.mulf %98, %100 : vector<16x32xf32>
    %c80 = arith.constant 80 : index
    %c0_41 = arith.constant 0 : index
    %102 = vector.load %arg3[%c80, %c0_41] : memref<200x128xf32, #tpu.memory_space<vmem>>, vector<1x32xf32>
    %103 = vector.broadcast %102 : vector<1x32xf32> to vector<16x32xf32>
    %104 = arith.addf %101, %103 : vector<16x32xf32>
    %105 = arith.truncf %104 : vector<16x32xf32> to vector<16x32xbf16>
    %c224 = arith.constant 224 : index
    %c0_42 = arith.constant 0 : index
    %106 = vector.load %arg2[%c224, %c0_42] : memref<480x128xbf16, #tpu.memory_space<vmem>>, vector<32x64xbf16>
    %cst_43 = arith.constant dense<0.000000e+00> : vector<16x64xf32>
    %107 = tpu.matmul %105, %106, %cst_43 {dimension_numbers = #tpu.dot_dimension_numbers<[1], [0], [0], [1], [0, 0, 1, 1], [], []>} : vector<16x32xbf16>, vector<32x64xbf16>, vector<16x64xf32> -> vector<16x64xf32>
    %c96_44 = arith.constant 96 : index
    %c0_45 = arith.constant 0 : index
    %108 = vector.load %arg3[%c96_44, %c0_45] : memref<200x128xf32, #tpu.memory_space<vmem>>, vector<16x64xf32>
    %109 = arith.addf %107, %108 : vector<16x64xf32>
    %110 = vector.extract_strided_slice %109 {offsets = [0, 0], sizes = [16, 32], strides = [1, 1]} : vector<16x64xf32> to vector<16x32xf32>
    %111 = vector.extract_strided_slice %109 {offsets = [0, 32], sizes = [16, 32], strides = [1, 1]} : vector<16x64xf32> to vector<16x32xf32>
    %c88 = arith.constant 88 : index
    %c0_46 = arith.constant 0 : index
    %112 = vector.load %arg3[%c88, %c0_46] : memref<200x128xf32, #tpu.memory_space<vmem>>, vector<8x32xf32>
    %113 = arith.truncf %112 : vector<8x32xf32> to vector<8x32xbf16>
    %114 = arith.truncf %110 : vector<16x32xf32> to vector<16x32xbf16>
    %cst_47 = arith.constant dense<0.000000e+00> : vector<8x16xf32>
    %115 = tpu.matmul %113, %114, %cst_47 {dimension_numbers = #tpu.dot_dimension_numbers<[1], [1], [0], [0], [0, 0, 1, 0], [], []>} : vector<8x32xbf16>, vector<16x32xbf16>, vector<8x16xf32> -> vector<8x16xf32>
    %cst_48 = arith.constant dense<0xFF800000> : vector<8xf32>
    %116 = vector.multi_reduction <maximumf>, %115, %cst_48 [1] : vector<8x16xf32> to vector<8xf32>
    %117 = vector.shape_cast %116 : vector<8xf32> to vector<8x1xf32>
    %118 = vector.broadcast %117 : vector<8x1xf32> to vector<8x16xf32>
    %119 = arith.subf %115, %118 : vector<8x16xf32>
    %120 = math.exp %119 : vector<8x16xf32>
    %cst_49 = arith.constant dense<0.000000e+00> : vector<8xf32>
    %121 = vector.multi_reduction <add>, %120, %cst_49 [1] : vector<8x16xf32> to vector<8xf32>
    %122 = vector.shape_cast %121 : vector<8xf32> to vector<8x1xf32>
    %123 = tpu.reciprocal %122 {approx = true} : vector<8x1xf32> -> vector<8x1xf32>
    %124 = vector.broadcast %123 : vector<8x1xf32> to vector<8x16xf32>
    %125 = arith.mulf %120, %124 : vector<8x16xf32>
    %126 = arith.truncf %125 : vector<8x16xf32> to vector<8x16xbf16>
    %127 = arith.truncf %111 : vector<16x32xf32> to vector<16x32xbf16>
    %cst_50 = arith.constant dense<0.000000e+00> : vector<8x32xf32>
    %128 = tpu.matmul %126, %127, %cst_50 {dimension_numbers = #tpu.dot_dimension_numbers<[1], [0], [0], [1], [0, 0, 1, 1], [], []>} : vector<8x16xbf16>, vector<16x32xbf16>, vector<8x32xf32> -> vector<8x32xf32>
    %c120 = arith.constant 120 : index
    %c0_51 = arith.constant 0 : index
    %129 = vector.load %arg3[%c120, %c0_51] : memref<200x128xf32, #tpu.memory_space<vmem>>, vector<1x32xf32>
    %130 = arith.truncf %128 : vector<8x32xf32> to vector<8x32xbf16>
    %c256 = arith.constant 256 : index
    %c0_52 = arith.constant 0 : index
    %131 = vector.load %arg2[%c256, %c0_52] : memref<480x128xbf16, #tpu.memory_space<vmem>>, vector<32x32xbf16>
    %cst_53 = arith.constant dense<0.000000e+00> : vector<8x32xf32>
    %132 = tpu.matmul %130, %131, %cst_53 {dimension_numbers = #tpu.dot_dimension_numbers<[1], [0], [0], [1], [0, 0, 1, 1], [], []>} : vector<8x32xbf16>, vector<32x32xbf16>, vector<8x32xf32> -> vector<8x32xf32>
    %c112 = arith.constant 112 : index
    %c0_54 = arith.constant 0 : index
    %133 = vector.load %arg3[%c112, %c0_54] : memref<200x128xf32, #tpu.memory_space<vmem>>, vector<1x32xf32>
    %134 = vector.broadcast %133 : vector<1x32xf32> to vector<8x32xf32>
    %135 = arith.addf %132, %134 : vector<8x32xf32>
    %136 = vector.broadcast %129 : vector<1x32xf32> to vector<8x32xf32>
    %137 = arith.addf %136, %135 : vector<8x32xf32>
    %cst_55 = arith.constant dense<0.000000e+00> : vector<8xf32>
    %138 = vector.multi_reduction <add>, %137, %cst_55 [1] : vector<8x32xf32> to vector<8xf32>
    %139 = vector.shape_cast %138 : vector<8xf32> to vector<8x1xf32>
    %cst_56 = arith.constant 3.200000e+01 : f32
    %140 = vector.broadcast %cst_56 : f32 to vector<8x1xf32>
    %141 = arith.divf %139, %140 : vector<8x1xf32>
    %142 = vector.broadcast %141 : vector<8x1xf32> to vector<8x32xf32>
    %143 = arith.subf %137, %142 : vector<8x32xf32>
    %144 = arith.mulf %143, %143 : vector<8x32xf32>
    %cst_57 = arith.constant dense<0.000000e+00> : vector<8xf32>
    %145 = vector.multi_reduction <add>, %144, %cst_57 [1] : vector<8x32xf32> to vector<8xf32>
    %146 = vector.shape_cast %145 : vector<8xf32> to vector<8x1xf32>
    %cst_58 = arith.constant 3.200000e+01 : f32
    %147 = vector.broadcast %cst_58 : f32 to vector<8x1xf32>
    %148 = arith.divf %146, %147 : vector<8x1xf32>
    %cst_59 = arith.constant 9.99999974E-6 : f32
    %149 = vector.broadcast %cst_59 : f32 to vector<8x1xf32>
    %150 = arith.addf %148, %149 : vector<8x1xf32>
    %151 = math.rsqrt %150 : vector<8x1xf32>
    %152 = vector.broadcast %151 : vector<8x1xf32> to vector<8x32xf32>
    %153 = arith.mulf %143, %152 : vector<8x32xf32>
    %c128_60 = arith.constant 128 : index
    %c0_61 = arith.constant 0 : index
    %154 = vector.load %arg3[%c128_60, %c0_61] : memref<200x128xf32, #tpu.memory_space<vmem>>, vector<1x32xf32>
    %155 = vector.broadcast %154 : vector<1x32xf32> to vector<8x32xf32>
    %156 = arith.mulf %153, %155 : vector<8x32xf32>
    %c136 = arith.constant 136 : index
    %c0_62 = arith.constant 0 : index
    %157 = vector.load %arg3[%c136, %c0_62] : memref<200x128xf32, #tpu.memory_space<vmem>>, vector<1x32xf32>
    %158 = vector.broadcast %157 : vector<1x32xf32> to vector<8x32xf32>
    %159 = arith.addf %156, %158 : vector<8x32xf32>
    %160 = arith.truncf %159 : vector<8x32xf32> to vector<8x32xbf16>
    %c288 = arith.constant 288 : index
    %c0_63 = arith.constant 0 : index
    %161 = vector.load %arg2[%c288, %c0_63] : memref<480x128xbf16, #tpu.memory_space<vmem>>, vector<32x64xbf16>
    %cst_64 = arith.constant dense<0.000000e+00> : vector<8x64xf32>
    %162 = tpu.matmul %160, %161, %cst_64 {dimension_numbers = #tpu.dot_dimension_numbers<[1], [0], [0], [1], [0, 0, 1, 1], [], []>} : vector<8x32xbf16>, vector<32x64xbf16>, vector<8x64xf32> -> vector<8x64xf32>
    %c144 = arith.constant 144 : index
    %c0_65 = arith.constant 0 : index
    %163 = vector.load %arg3[%c144, %c0_65] : memref<200x128xf32, #tpu.memory_space<vmem>>, vector<1x64xf32>
    %164 = vector.broadcast %163 : vector<1x64xf32> to vector<8x64xf32>
    %165 = arith.addf %162, %164 : vector<8x64xf32>
    %cst_66 = arith.constant 0.000000e+00 : f32
    %166 = vector.broadcast %cst_66 : f32 to vector<8x64xf32>
    %167 = arith.maximumf %165, %166 : vector<8x64xf32>
    %168 = arith.truncf %167 : vector<8x64xf32> to vector<8x64xbf16>
    %c320 = arith.constant 320 : index
    %c0_67 = arith.constant 0 : index
    %169 = vector.load %arg2[%c320, %c0_67] : memref<480x128xbf16, #tpu.memory_space<vmem>>, vector<64x32xbf16>
    %cst_68 = arith.constant dense<0.000000e+00> : vector<8x32xf32>
    %170 = tpu.matmul %168, %169, %cst_68 {dimension_numbers = #tpu.dot_dimension_numbers<[1], [0], [0], [1], [0, 0, 1, 1], [], []>} : vector<8x64xbf16>, vector<64x32xbf16>, vector<8x32xf32> -> vector<8x32xf32>
    %c152 = arith.constant 152 : index
    %c0_69 = arith.constant 0 : index
    %171 = vector.load %arg3[%c152, %c0_69] : memref<200x128xf32, #tpu.memory_space<vmem>>, vector<1x32xf32>
    %172 = vector.broadcast %171 : vector<1x32xf32> to vector<8x32xf32>
    %173 = arith.addf %170, %172 : vector<8x32xf32>
    %174 = arith.addf %159, %173 : vector<8x32xf32>
    %cst_70 = arith.constant dense<0.000000e+00> : vector<8xf32>
    %175 = vector.multi_reduction <add>, %174, %cst_70 [1] : vector<8x32xf32> to vector<8xf32>
    %176 = vector.shape_cast %175 : vector<8xf32> to vector<8x1xf32>
    %cst_71 = arith.constant 3.200000e+01 : f32
    %177 = vector.broadcast %cst_71 : f32 to vector<8x1xf32>
    %178 = arith.divf %176, %177 : vector<8x1xf32>
    %179 = vector.broadcast %178 : vector<8x1xf32> to vector<8x32xf32>
    %180 = arith.subf %174, %179 : vector<8x32xf32>
    %181 = arith.mulf %180, %180 : vector<8x32xf32>
    %cst_72 = arith.constant dense<0.000000e+00> : vector<8xf32>
    %182 = vector.multi_reduction <add>, %181, %cst_72 [1] : vector<8x32xf32> to vector<8xf32>
    %183 = vector.shape_cast %182 : vector<8xf32> to vector<8x1xf32>
    %cst_73 = arith.constant 3.200000e+01 : f32
    %184 = vector.broadcast %cst_73 : f32 to vector<8x1xf32>
    %185 = arith.divf %183, %184 : vector<8x1xf32>
    %cst_74 = arith.constant 9.99999974E-6 : f32
    %186 = vector.broadcast %cst_74 : f32 to vector<8x1xf32>
    %187 = arith.addf %185, %186 : vector<8x1xf32>
    %188 = math.rsqrt %187 : vector<8x1xf32>
    %189 = vector.broadcast %188 : vector<8x1xf32> to vector<8x32xf32>
    %190 = arith.mulf %180, %189 : vector<8x32xf32>
    %c160_75 = arith.constant 160 : index
    %c0_76 = arith.constant 0 : index
    %191 = vector.load %arg3[%c160_75, %c0_76] : memref<200x128xf32, #tpu.memory_space<vmem>>, vector<1x32xf32>
    %192 = vector.broadcast %191 : vector<1x32xf32> to vector<8x32xf32>
    %193 = arith.mulf %190, %192 : vector<8x32xf32>
    %c168 = arith.constant 168 : index
    %c0_77 = arith.constant 0 : index
    %194 = vector.load %arg3[%c168, %c0_77] : memref<200x128xf32, #tpu.memory_space<vmem>>, vector<1x32xf32>
    %195 = vector.broadcast %194 : vector<1x32xf32> to vector<8x32xf32>
    %196 = arith.addf %193, %195 : vector<8x32xf32>
    %197 = arith.truncf %196 : vector<8x32xf32> to vector<8x32xbf16>
    %c384 = arith.constant 384 : index
    %c0_78 = arith.constant 0 : index
    %198 = vector.load %arg2[%c384, %c0_78] : memref<480x128xbf16, #tpu.memory_space<vmem>>, vector<32x37xbf16>
    %cst_79 = arith.constant dense<0.000000e+00> : vector<8x37xf32>
    %199 = tpu.matmul %197, %198, %cst_79 {dimension_numbers = #tpu.dot_dimension_numbers<[1], [0], [0], [1], [0, 0, 1, 1], [], []>} : vector<8x32xbf16>, vector<32x37xbf16>, vector<8x37xf32> -> vector<8x37xf32>
    %c176 = arith.constant 176 : index
    %c0_80 = arith.constant 0 : index
    %200 = vector.load %arg3[%c176, %c0_80] : memref<200x128xf32, #tpu.memory_space<vmem>>, vector<1x37xf32>
    %201 = vector.broadcast %200 : vector<1x37xf32> to vector<8x37xf32>
    %202 = arith.addf %199, %201 : vector<8x37xf32>
    %203 = vector.extract_strided_slice %202 {offsets = [0, 0], sizes = [8, 5], strides = [1, 1]} : vector<8x37xf32> to vector<8x5xf32>
    %204 = vector.extract_strided_slice %202 {offsets = [0, 5], sizes = [8, 32], strides = [1, 1]} : vector<8x37xf32> to vector<8x32xf32>
    %cst_81 = arith.constant 0.000000e+00 : f32
    %205 = vector.broadcast %cst_81 : f32 to vector<8x32xf32>
    %206 = arith.maximumf %204, %205 : vector<8x32xf32>
    %207 = arith.truncf %206 : vector<8x32xf32> to vector<8x32xbf16>
    %c416 = arith.constant 416 : index
    %c0_82 = arith.constant 0 : index
    %208 = vector.load %arg2[%c416, %c0_82] : memref<480x128xbf16, #tpu.memory_space<vmem>>, vector<32x32xbf16>
    %cst_83 = arith.constant dense<0.000000e+00> : vector<8x32xf32>
    %209 = tpu.matmul %207, %208, %cst_83 {dimension_numbers = #tpu.dot_dimension_numbers<[1], [0], [0], [1], [0, 0, 1, 1], [], []>} : vector<8x32xbf16>, vector<32x32xbf16>, vector<8x32xf32> -> vector<8x32xf32>
    %c184 = arith.constant 184 : index
    %c0_84 = arith.constant 0 : index
    %210 = vector.load %arg3[%c184, %c0_84] : memref<200x128xf32, #tpu.memory_space<vmem>>, vector<1x32xf32>
    %211 = vector.broadcast %210 : vector<1x32xf32> to vector<8x32xf32>
    %212 = arith.addf %209, %211 : vector<8x32xf32>
    %cst_85 = arith.constant 0.000000e+00 : f32
    %213 = vector.broadcast %cst_85 : f32 to vector<8x32xf32>
    %214 = arith.maximumf %212, %213 : vector<8x32xf32>
    %215 = arith.truncf %214 : vector<8x32xf32> to vector<8x32xbf16>
    %c448 = arith.constant 448 : index
    %c0_86 = arith.constant 0 : index
    %216 = vector.load %arg2[%c448, %c0_86] : memref<480x128xbf16, #tpu.memory_space<vmem>>, vector<32x4xbf16>
    %cst_87 = arith.constant dense<0.000000e+00> : vector<8x4xf32>
    %217 = tpu.matmul %215, %216, %cst_87 {dimension_numbers = #tpu.dot_dimension_numbers<[1], [0], [0], [1], [0, 0, 1, 1], [], []>} : vector<8x32xbf16>, vector<32x4xbf16>, vector<8x4xf32> -> vector<8x4xf32>
    %c192 = arith.constant 192 : index
    %c0_88 = arith.constant 0 : index
    %218 = vector.load %arg3[%c192, %c0_88] : memref<200x128xf32, #tpu.memory_space<vmem>>, vector<1x4xf32>
    %219 = vector.broadcast %218 : vector<1x4xf32> to vector<8x4xf32>
    %220 = arith.addf %217, %219 : vector<8x4xf32>
    %cst_89 = arith.constant 0.000000e+00 : f32
    %221 = vector.broadcast %cst_89 : f32 to vector<8x4xf32>
    %222 = arith.subf %221, %220 : vector<8x4xf32>
    %223 = math.exp %222 : vector<8x4xf32>
    %cst_90 = arith.constant 1.000000e+00 : f32
    %224 = vector.broadcast %cst_90 : f32 to vector<8x4xf32>
    %225 = arith.addf %224, %223 : vector<8x4xf32>
    %cst_91 = arith.constant 1.000000e+00 : f32
    %226 = vector.broadcast %cst_91 : f32 to vector<8x4xf32>
    %227 = arith.divf %226, %225 : vector<8x4xf32>
    %cst_92 = arith.constant dense<0xFF800000> : vector<8xf32>
    %228 = vector.multi_reduction <maximumf>, %203, %cst_92 [1] : vector<8x5xf32> to vector<8xf32>
    %229 = vector.shape_cast %228 : vector<8xf32> to vector<8x1xf32>
    %230 = vector.broadcast %229 : vector<8x1xf32> to vector<8x5xf32>
    %231 = arith.subf %203, %230 : vector<8x5xf32>
    %232 = math.exp %231 : vector<8x5xf32>
    %cst_93 = arith.constant dense<0.000000e+00> : vector<8xf32>
    %233 = vector.multi_reduction <add>, %232, %cst_93 [1] : vector<8x5xf32> to vector<8xf32>
    %234 = vector.shape_cast %233 : vector<8xf32> to vector<8x1xf32>
    %235 = vector.broadcast %234 : vector<8x1xf32> to vector<8x5xf32>
    %236 = arith.divf %232, %235 : vector<8x5xf32>
    %237 = vector.extract_strided_slice %236 {offsets = [0, 0], sizes = [8, 4], strides = [1, 1]} : vector<8x5xf32> to vector<8x4xf32>
    %cst_94 = arith.constant dense<0xFF800000> : vector<8xf32>
    %238 = vector.multi_reduction <maximumf>, %237, %cst_94 [1] : vector<8x4xf32> to vector<8xf32>
    %239 = vector.shape_cast %238 : vector<8xf32> to vector<8x1xf32>
    %240 = tpu.iota {dimensions = array<i32: 1>} : vector<8x4xi32>
    %241 = vector.broadcast %239 : vector<8x1xf32> to vector<8x4xf32>
    %242 = arith.cmpf oeq, %237, %241 : vector<8x4xf32>
    %c1000000_i32 = arith.constant 1000000 : i32
    %243 = vector.broadcast %c1000000_i32 : i32 to vector<8x4xi32>
    %244 = arith.select %242, %240, %243 : vector<8x4xi1>, vector<8x4xi32>
    %cst_95 = arith.constant dense<2147483647> : vector<8xi32>
    %245 = vector.multi_reduction <minsi>, %244, %cst_95 [1] : vector<8x4xi32> to vector<8xi32>
    %246 = vector.shape_cast %245 : vector<8xi32> to vector<8x1xi32>
    %247 = arith.sitofp %246 : vector<8x1xi32> to vector<8x1xf32>
    %c0_96 = arith.constant 0 : index
    %248 = memref.load %arg0[%c0_96] : memref<2xf32, #tpu.memory_space<smem>>
    %c1 = arith.constant 1 : index
    %249 = memref.load %arg0[%c1] : memref<2xf32, #tpu.memory_space<smem>>
    %250 = vector.extract_strided_slice %227 {offsets = [0, 0], sizes = [8, 1], strides = [1, 1]} : vector<8x4xf32> to vector<8x1xf32>
    %251 = vector.extract_strided_slice %227 {offsets = [0, 1], sizes = [8, 1], strides = [1, 1]} : vector<8x4xf32> to vector<8x1xf32>
    %252 = vector.extract_strided_slice %227 {offsets = [0, 2], sizes = [8, 1], strides = [1, 1]} : vector<8x4xf32> to vector<8x1xf32>
    %253 = vector.extract_strided_slice %227 {offsets = [0, 3], sizes = [8, 1], strides = [1, 1]} : vector<8x4xf32> to vector<8x1xf32>
    %cst_97 = arith.constant 5.000000e-01 : f32
    %254 = vector.broadcast %cst_97 : f32 to vector<8x1xf32>
    %255 = arith.mulf %254, %252 : vector<8x1xf32>
    %256 = arith.subf %250, %255 : vector<8x1xf32>
    %257 = vector.broadcast %249 : f32 to vector<8x1xf32>
    %258 = arith.mulf %256, %257 : vector<8x1xf32>
    %cst_98 = arith.constant 5.000000e-01 : f32
    %259 = vector.broadcast %cst_98 : f32 to vector<8x1xf32>
    %260 = arith.mulf %259, %253 : vector<8x1xf32>
    %261 = arith.subf %251, %260 : vector<8x1xf32>
    %262 = vector.broadcast %248 : f32 to vector<8x1xf32>
    %263 = arith.mulf %261, %262 : vector<8x1xf32>
    %cst_99 = arith.constant 5.000000e-01 : f32
    %264 = vector.broadcast %cst_99 : f32 to vector<8x1xf32>
    %265 = arith.mulf %264, %252 : vector<8x1xf32>
    %266 = arith.addf %250, %265 : vector<8x1xf32>
    %267 = vector.broadcast %249 : f32 to vector<8x1xf32>
    %268 = arith.mulf %266, %267 : vector<8x1xf32>
    %cst_100 = arith.constant 5.000000e-01 : f32
    %269 = vector.broadcast %cst_100 : f32 to vector<8x1xf32>
    %270 = arith.mulf %269, %253 : vector<8x1xf32>
    %271 = arith.addf %251, %270 : vector<8x1xf32>
    %272 = vector.broadcast %248 : f32 to vector<8x1xf32>
    %273 = arith.mulf %271, %272 : vector<8x1xf32>
    %cst_101 = arith.constant 0.000000e+00 : f32
    %274 = vector.broadcast %cst_101 : f32 to vector<8x122xf32>
    %275 = tpu.concatenate %239, %258, %263, %268, %273, %247, %274 in 1 : vector<8x1xf32>, vector<8x1xf32>, vector<8x1xf32>, vector<8x1xf32>, vector<8x1xf32>, vector<8x1xf32>, vector<8x122xf32> -> vector<8x128xf32>
    %c0_102 = arith.constant 0 : index
    %c0_103 = arith.constant 0 : index
    %276 = vector.load %arg4[%c0_102, %c0_103] : memref<8x128xf32, #tpu.memory_space<vmem>>, vector<8x128xf32>
    tpu.vector_store %arg4[%c0_102, %c0_103], %275 {strides = array<i32>} : memref<8x128xf32, #tpu.memory_space<vmem>>, vector<8x128xf32>,
    return
  }
}

</mosaic_0001>

<bundles_post_ra>
// kernel: detr_wrapper_forward.1
= control target key start
LH: loop header
LB: loop body
LE: loop exit
PB: predicated region body
PF: predicated region fallthrough
CT: control target
= control target key end

     0   :  { %9 = vsyncpa [#allocation3], 0  ;;  %s1196_s18 = smov [#allocation2]   ;;  %s1476_s0 = inlined_call_operand.vmem [shape: f32[2], index: 0, kind: input, shape index: {}]   ;;  %s1477_s1 = inlined_call_operand.vmem [shape: f32[16,48], index: 1, kind: input, shape index: {}]   ;;  %s1478_s2 = inlined_call_operand.vmem [shape: bf16[480,128], index: 2, kind: input, shape index: {}]   ;;  %s1479_s3 = inlined_call_operand.vmem [shape: f32[200,128], index: 3, kind: input, shape index: {}]   ;;  %s1480_s4 = inlined_call_operand.vmem [shape: f32[8,128], index: 4, kind: output, shape index: {}]  }
   0x1   :  { %s15_s17 = sshll.u32 %s1476_s0, 4  ;;  %s16_s17 = int_to_ptr.vmem [resolvable:$true] %s15_s17 }
   0x2   :  { %18 = dma.vmem_to_smem %s16_s17, 16, %s1196_s18, [#allocation3]  }
   0x3   :  { %1194 = dma.done.wait [#allocation3], 16  }
   0x4   :  { %1195 = vsyncadd [#allocation3], 4294967280 }
   0x5   :  { %29 = sfence }
   0x6   :  { %v1092_v0 = vld [vmem:[%s1478_s2 + $0x10] sm:$0xff]  ;;  %v1091_v1 = vld [vmem:[%s1478_s2 + $0x8] sm:$0xff]  ;;  %v1090_v2 = vld [vmem:[%s1478_s2] sm:$0xff]  ;;  %vm60_vm0 = vcmask 392192   ;;  %vm91_vm1 = vcmask 130048   ;;  %vm128_vm2 = vcmask 261120  }
   0x7   :  { %69 = vmatpush.bf16.msra.mxu0 %v1092_v0  ;;  %v31_v3 = vld [vmem:[%s1477_s1] sm:$0xff]  ;;  %v32_v4 = vld [vmem:[%s1477_s1 + $0x8] sm:$0xff]  ;;  %v1093_v6 = vld [vmem:[%s1478_s2 + $0x18] sm:$0xff]  ;;  %s1197_s15 = smov 96   ;;  %s1198_s16 = smov 64   ;;  %vm383_vm10 = vcmask 523264  }
   0x8   :  { %v33_v5 = vpack.c.bf16 %v32_v4, %v31_v3  ;;  %102 = vmatpush.bf16.msra.mxu1 %v1093_v6  ;;  %v1128_v8 = vld [vmem:[%s1479_s3] ss:$0 sm:$0xff]  ;;  %v1095_v15 = vld [vmem:[%s1478_s2 + $0x28] sm:$0xff]  ;;  %v114_v24 = vld [vmem:[%s1479_s3 + $0x10] sm:$0xff]  ;;  %v1199_v4 = vmov 32.0   ;;  %s905_s24 = sld [smem:[#allocation2]] }
   0x9   :  { %138 = vmatpush.bf16.msra.mxu2 %v1095_v15  ;;  %v1094_v16 = vld [vmem:[%s1478_s2 + $0x20] sm:$0xff]  ;;  %v1129_v18 = vld [vmem:[%s1479_s3 + $0x8] ss:$0 sm:$0xff]  ;;  %v115_v25 = vld [vmem:[%s1479_s3 + $0x18] sm:$0xff]  ;;  %s1089_s0 = sld [smem:[#allocation2 + $0x1]]  ;;  %s1202_s25 = smov 3  }
   0xa   :  { %v1097_v54 = vld [vmem:[%s1478_s2 + $0x38] sm:$0xff]  ;;  %v1096_v55 = vld [vmem:[%s1478_s2 + $0x30] sm:$0xff]  ;;  %v1130_v59 = vld [vmem:[%s1479_s3 + $0x20] ss:$0 sm:$0xff]  ;;  %s1203_s26 = smov 1  }
   0xb   :  { %70 = vmatpush.bf16.msra.mxu0 %v1091_v1 }
   0xd   :  { %139 = vmatpush.bf16.msra.mxu2 %v1094_v16 }
   0xf   :  { %71 = vmatpush.bf16.msra.mxu0 %v1090_v2 }
  0x11   :  { %241 = vmatpush.bf16.msrb.mxu2 %v1097_v54  ;;  %v1101_v54 = vld [vmem:[%s1478_s2 + $0x58] sm:$0xff] }
  0x12   :  { %964 = vmatmul.msk.bf16.vlgmr.msra.gmra.mxu0 %vm60_vm0, %v33_v5 }
  0x15   :  { %242 = vmatpush.bf16.msrb.mxu2 %v1096_v55  ;;  %v1100_v55 = vld [vmem:[%s1478_s2 + $0x50] sm:$0xff] }
  0x8f   :  { %v73_v7 = vpop.f32.mrf.mxu0 }
  0x90   :  { %v74_v9 = vadd.f32 %v1128_v8, %v73_v7 }
  0x92   :  { %v78_v12 = vmax.f32 %v74_v9, 0.0 }
  0x97   :  { %v75_v10 = vpop.f32.mrf.mxu0 }
  0x98   :  { %v76_v11 = vadd.f32 %v1128_v8, %v75_v10 }
  0x9a   :  { %v79_v13 = vmax.f32 %v76_v11, 0.0 }
  0x9c   :  { %v80_v14 = vpack.c.bf16 %v79_v13, %v78_v12 }
  0x9e   :  { %969 = vmatmul.msk.bf16.vlgmr.msra.gmra.mxu1 %vm91_vm1, %v80_v14 }
 0x11b   :  { %v104_v17 = vpop.f32.mrf.mxu1 }
 0x11c   :  { %v1263_v20 = vadd.f32 %v1129_v18, %v104_v17 }
 0x123   :  { %v106_v19 = vpop.f32.mrf.mxu1 }
 0x124   :  { %v1265_v21 = vadd.f32 %v1129_v18, %v106_v19 }
 0x126   :  { %v109_v22 = vpack.c.bf16 %v1265_v21, %v1263_v20 }
 0x128   :  { %978 = vmatmul.msk.bf16.vlgmr.msra.gmra.mxu2 %vm128_vm2, %v109_v22 }
 0x1ab   :  { %v141_v23 = vpop.f32.mrf.mxu2 }
 0x1ac   :  { %v142_v27 = vadd.f32 %v141_v23, %v114_v24  ;;  %v1098_v23 = vld [vmem:[%s1478_s2 + $0x40] sm:$0xff] }
 0x1b3   :  { %v143_v26 = vpop.f32.mrf.mxu2 }
 0x1b4   :  { %v144_v28 = vadd.f32 %v143_v26, %v115_v25 }
 0x1b6   :  { %v146_v29 = vpack.c.bf16 %v144_v28, %v142_v27 }
 0x1b8   :  { %148 = vrot.lane.b32.xlu0 %v146_v29, %s1197_s15 }
 0x22a   :  { %v149_v30 = vpop.permute.xlu0 %148 }
 0x22b   :  { %v154_v31 = vsel %vm128_vm2, %v149_v30, 0 }
 0x22c   :  { %163 = vmatpush.bf16.xpose.msra.mxu3 %v154_v31 }
 0x233   :  { %979 = vmatmul.msk.bf16.vlgmr.msra.gmra.mxu3 %vm128_vm2, %v146_v29 }
 0x2b6   :  { %v165_v32 = vpop.f32.mrf.mxu3 }
 0x2b7   :  { %v170_v33 = vsel %vm91_vm1, %v165_v32, -inf }
 0x2b8   :  { %171 = vmax.xlane.f32.xlu0 %v170_v33 }
 0x2be   :  { %v167_v34 = vpop.f32.mrf.mxu3 }
 0x2bf   :  { %v173_v35 = vsel %vm91_vm1, %v167_v34, -inf }
 0x2c0   :  { %174 = vmax.xlane.f32.xlu1 %v173_v35 }
 0x32b   :  { %v172_v36 = vpop.xlane.xlu0 %171 }
 0x32c   :  { %v176_v37 = vsub.f32 %v165_v32, %v172_v36 }
 0x32e   :  { %v178_v38 = vmul.f32 1.442695, %v176_v37 }
 0x330   :  { %1148 = vpow2.f32 %v178_v38 }
 0x333   :  { %v175_v39 = vpop.xlane.xlu1 %174 }
 0x334   :  { %v177_v40 = vsub.f32 %v167_v34, %v175_v39 }
 0x336   :  { %v1149_v41 = vpop.eup %1148  ;;  %v180_v42 = vmul.f32 1.442695, %v177_v40 }
 0x337   :  { %v182_v43 = vsel %vm91_vm1, %v1149_v41, 0.0 }
 0x338   :  { %1150 = vpow2.f32 %v180_v42  ;;  %183 = vadd.xlane.f32.xlu1 %v182_v43  ;;  %v1131_v42 = vld [vmem:[%s1479_s3 + $0x28] ss:$0 sm:$0xff] }
 0x33e   :  { %v1151_v44 = vpop.eup %1150 }
 0x33f   :  { %v185_v45 = vsel %vm91_vm1, %v1151_v44, 0.0 }
 0x340   :  { %186 = vadd.xlane.f32.xlu2 %v185_v45 }
 0x358   :  { %193 = vrot.lane.b32.xlu2 %v146_v29, %s1198_s16  ;;  %s1200_s16 = smov 123  }
 0x3ab   :  { %v184_v46 = vpop.xlane.xlu1 %183 }
 0x3ac   :  { %1152 = vrcp.f32 %v184_v46 }
 0x3b2   :  { %v1153_v48 = vpop.eup %1152 }
 0x3b3   :  { %v187_v47 = vpop.xlane.xlu2 %186  ;;  %v190_v50 = vmul.f32 %v1153_v48, %v1149_v41 }
 0x3b4   :  { %1154 = vrcp.f32 %v187_v47  ;;  %v1132_v47 = vld [vmem:[%s1479_s3 + $0x30] ss:$0 sm:$0xff] }
 0x3b5   :  { %1156 = vrcp.f32 %v1199_v4 }
 0x3ba   :  { %v1155_v49 = vpop.eup %1154 }
 0x3bb   :  { %v191_v51 = vmul.f32 %v1155_v49, %v1151_v44  ;;  %v194_v52 = vpop.permute.xlu2 %193  ;;  %v1157_v5 = vpop.eup %1156 }
 0x3bc   :  { %206 = vmatpush.bf16.msrb.mxu1 %v194_v52  ;;  %v258_v6 = vmul.f32 32.0, %v1157_v5  ;;  %vm262_vm3 = vweird.f32 %v1157_v5  ;;  %v1103_v52 = vld [vmem:[%s1478_s2 + $0x68] sm:$0xff] }
 0x3bd   :  { %v192_v53 = vpack.c.bf16 %v191_v51, %v190_v50  ;;  %391 = vmatpush.bf16.msrb.mxu0 %v1103_v52  ;;  %v460_v52 = vld [vmem:[%s1479_s3 + $0x60] sm:$0xff] }
 0x3be   :  { %v259_v7 = vsub.f32 1.0, %v258_v6 }
 0x3bf   :  { %980 = vmatmul.msk.bf16.vlgmr.msrb.gmra.mxu1 %vm91_vm1, %v192_v53  ;;  %v1102_v53 = vld [vmem:[%s1478_s2 + $0x60] sm:$0xff] }
 0x3c0   :  { %v260_v8 = vmul.f32 %v1157_v5, %v259_v7 }
 0x3c1   :  { %392 = vmatpush.bf16.msrb.mxu0 %v1102_v53  ;;  %v461_v53 = vld [vmem:[%s1479_s3 + $0x68] sm:$0xff] }
 0x3c2   :  { %v261_v9 = vadd.f32 %v1157_v5, %v260_v8 }
 0x3c4   :  { %v1298_v10 = vsel %vm262_vm3, %v1157_v5, %v261_v9 }
 0x3c5   :  { %393 = vmatpush.bf16.msrb.mxu0 %v1101_v54 }
 0x3c9   :  { %394 = vmatpush.bf16.msrb.mxu0 %v1100_v55 }
 0x43c   :  { %v208_v56 = vpop.f32.mrf.mxu1 }
 0x444   :  { %v210_v57 = vpop.f32.mrf.mxu1 }
 0x445   :  { %v213_v58 = vpack.c.bf16 %v210_v57, %v208_v56  ;;  %v1133_v57 = vld [vmem:[%s1479_s3 + $0x38] ss:$0 sm:$0xff] }
 0x447   :  { %989 = vmatmul.msk.bf16.vlgmr.msrb.gmra.mxu2 %vm128_vm2, %v213_v58 }
 0x4ca   :  { %v244_v60 = vpop.f32.mrf.mxu2 }
 0x4cb   :  { %v245_v61 = vadd.f32 %v1130_v59, %v244_v60 }
 0x4cd   :  { %v249_v62 = vadd.f32 %v245_v61, %v1263_v20 }
 0x4cf   :  { %v251_v63 = vsel %vm128_vm2, %v249_v62, 0.0 }
 0x4d0   :  { %252 = vadd.xlane.f32.xlu1 %v251_v63 }
 0x4d2   :  { %v246_v0 = vpop.f32.mrf.mxu2 }
 0x4d3   :  { %v247_v1 = vadd.f32 %v1130_v59, %v246_v0  ;;  %v1134_v0 = vld [vmem:[%s1479_s3 + $0x40] ss:$0 sm:$0xff] }
 0x4d5   :  { %v250_v2 = vadd.f32 %v247_v1, %v1265_v21  ;;  %v1099_v21 = vld [vmem:[%s1478_s2 + $0x48] sm:$0xff] }
 0x4d6   :  { %338 = vmatpush.bf16.msrb.mxu3 %v1099_v21 }
 0x4d7   :  { %v254_v3 = vsel %vm128_vm2, %v250_v2, 0.0 }
 0x4d8   :  { %255 = vadd.xlane.f32.xlu1 %v254_v3 }
 0x4da   :  { %339 = vmatpush.bf16.msrb.mxu3 %v1098_v23  ;;  %v1104_v23 = vld [vmem:[%s1478_s2 + $0x70] sm:$0xff] }
 0x543   :  { %v253_v11 = vpop.xlane.xlu1 %252 }
 0x544   :  { %v264_v12 = vmul.f32 %v1298_v10, %v253_v11 }
 0x546   :  { %v266_v13 = vsub.f32 %v249_v62, %v264_v12 }
 0x548   :  { %v268_v14 = vmul.f32 %v266_v13, %v266_v13 }
 0x54a   :  { %v270_v15 = vsel %vm128_vm2, %v268_v14, 0.0 }
 0x54b   :  { %271 = vadd.xlane.f32.xlu1 %v270_v15  ;;  %v256_v16 = vpop.xlane.xlu1 %255 }
 0x54c   :  { %v265_v17 = vmul.f32 %v1298_v10, %v256_v16 }
 0x54e   :  { %v267_v18 = vsub.f32 %v250_v2, %v265_v17 }
 0x550   :  { %v269_v19 = vmul.f32 %v267_v18, %v267_v18 }
 0x552   :  { %v273_v20 = vsel %vm128_vm2, %v269_v19, 0.0 }
 0x553   :  { %274 = vadd.xlane.f32.xlu2 %v273_v20  ;;  %v1105_v20 = vld [vmem:[%s1478_s2 + $0x78] sm:$0xff] }
 0x554   :  { %483 = vmatpush.bf16.msra.mxu1 %v1105_v20 }
 0x558   :  { %484 = vmatpush.bf16.msra.mxu1 %v1104_v23 }
 0x5be   :  { %v272_v22 = vpop.xlane.xlu1 %271 }
 0x5bf   :  { %v276_v24 = vmul.f32 %v272_v22, %v1298_v10 }
 0x5c1   :  { %v278_v25 = vadd.f32 1e-05, %v276_v24 }
 0x5c3   :  { %1158 = vrsqrt.f32 %v278_v25  ;;  %vm286_vm5 = vweird.f32 %v278_v25 }
 0x5c6   :  { %v275_v26 = vpop.xlane.xlu2 %274 }
 0x5c7   :  { %v277_v27 = vmul.f32 %v275_v26, %v1298_v10 }
 0x5c9   :  { %v1159_v28 = vpop.eup %1158  ;;  %v279_v29 = vadd.f32 1e-05, %v277_v27 }
 0x5ca   :  { %v281_v30 = vmul.f32 %v1159_v28, %v278_v25  ;;  %vm287_vm4 = vweird.f32 %v1159_v28 }
 0x5cb   :  { %1160 = vrsqrt.f32 %v279_v29  ;;  %vm288_vm6 = vmor %vm286_vm5, %vm287_vm4  ;;  %vm296_vm8 = vweird.f32 %v279_v29 }
 0x5cc   :  { %v282_v31 = vmul.f32 %v1159_v28, %v281_v30 }
 0x5ce   :  { %v283_v32 = vmul.f32 0.5, %v282_v31 }
 0x5d0   :  { %v284_v33 = vsub.f32 1.5, %v283_v32 }
 0x5d1   :  { %v1161_v34 = vpop.eup %1160 }
 0x5d2   :  { %v285_v35 = vmul.f32 %v1159_v28, %v284_v33  ;;  %v291_v36 = vmul.f32 %v1161_v34, %v279_v29  ;;  %vm297_vm7 = vweird.f32 %v1161_v34 }
 0x5d3   :  { %vm298_vm9 = vmor %vm296_vm8, %vm297_vm7  ;;  %vm856_vm8 = vcmask 39936  }
 0x5d4   :  { %v292_v37 = vmul.f32 %v1161_v34, %v291_v36  ;;  %v289_v38 = vsel %vm288_vm6, %v1159_v28, %v285_v35 }
 0x5d5   :  { %v300_v41 = vmul.f32 %v289_v38, %v266_v13 }
 0x5d6   :  { %v293_v39 = vmul.f32 0.5, %v292_v37 }
 0x5d7   :  { %v304_v46 = vmul.f32 %v1131_v42, %v300_v41 }
 0x5d8   :  { %v294_v40 = vsub.f32 1.5, %v293_v39 }
 0x5d9   :  { %v308_v49 = vadd.f32 %v1132_v47, %v304_v46 }
 0x5da   :  { %v295_v43 = vmul.f32 %v1161_v34, %v294_v40  ;;  %v1135_v40 = vld [vmem:[%s1479_s3 + $0x48] ss:$0 sm:$0xff] }
 0x5dc   :  { %v299_v44 = vsel %vm298_vm9, %v1161_v34, %v295_v43 }
 0x5dd   :  { %v301_v45 = vmul.f32 %v299_v44, %v267_v18  ;;  %v1136_v44 = vld [vmem:[%s1479_s3 + $0x50] ss:$0 sm:$0xff] }
 0x5df   :  { %v305_v48 = vmul.f32 %v1131_v42, %v301_v45 }
 0x5e1   :  { %v309_v50 = vadd.f32 %v1132_v47, %v305_v48 }
 0x5e3   :  { %v310_v51 = vpack.c.bf16 %v309_v50, %v308_v49 }
 0x5e5   :  { %998 = vmatmul.msk.bf16.vlgmr.msrb.gmra.mxu3 %vm128_vm2, %v310_v51 }
 0x668   :  { %v341_v56 = vpop.f32.mrf.mxu3 }
 0x669   :  { %v342_v58 = vadd.f32 %v1133_v57, %v341_v56 }
 0x66b   :  { %v346_v61 = vmax.f32 %v342_v58, 0.0 }
 0x670   :  { %v343_v59 = vpop.f32.mrf.mxu3 }
 0x671   :  { %v344_v60 = vadd.f32 %v1133_v57, %v343_v59  ;;  %v491_v59 = vld [vmem:[%s1479_s3 + $0x58] sm:$0xff] }
 0x673   :  { %v347_v62 = vmax.f32 %v344_v60, 0.0  ;;  %v492_v60 = vpack.c.bf16 %v491_v59, %v491_v59 }
 0x675   :  { %v348_v63 = vpack.c.bf16 %v347_v62, %v346_v61 }
 0x677   :  { %1015 = vmatmul.msk.bf16.vlgmr.msrb.gmra.mxu0 %vm383_vm10, %v348_v63 }
 0x6f4   :  { %v396_v1 = vpop.f32.mrf.mxu0 }
 0x6f5   :  { %v397_v2 = vadd.f32 %v1134_v0, %v396_v1 }
 0x6f7   :  { %v401_v3 = vadd.f32 %v397_v2, %v308_v49 }
 0x6f9   :  { %v403_v4 = vsel %vm128_vm2, %v401_v3, 0.0 }
 0x6fa   :  { %404 = vadd.xlane.f32.xlu1 %v403_v4 }
 0x6fc   :  { %v398_v5 = vpop.f32.mrf.mxu0 }
 0x6fd   :  { %v399_v6 = vadd.f32 %v1134_v0, %v398_v5 }
 0x6ff   :  { %v402_v7 = vadd.f32 %v399_v6, %v309_v50  ;;  %v1107_v6 = vld [vmem:[%s1478_s2 + $0x88] sm:$0xff] }
 0x700   :  { %574 = vmatpush.bf16.msra.mxu0 %v1107_v6 }
 0x701   :  { %v406_v8 = vsel %vm128_vm2, %v402_v7, 0.0 }
 0x702   :  { %407 = vadd.xlane.f32.xlu1 %v406_v8 }
 0x76d   :  { %v405_v9 = vpop.xlane.xlu1 %404 }
 0x76e   :  { %v409_v11 = vmul.f32 %v405_v9, %v1298_v10 }
 0x770   :  { %v411_v12 = vsub.f32 %v401_v3, %v409_v11 }
 0x772   :  { %v413_v13 = vmul.f32 %v411_v12, %v411_v12 }
 0x774   :  { %v415_v14 = vsel %vm128_vm2, %v413_v13, 0.0 }
 0x775   :  { %416 = vadd.xlane.f32.xlu0 %v415_v14  ;;  %v408_v15 = vpop.xlane.xlu1 %407 }
 0x776   :  { %v410_v16 = vmul.f32 %v408_v15, %v1298_v10 }
 0x778   :  { %v412_v17 = vsub.f32 %v402_v7, %v410_v16  ;;  %v1137_v16 = vld [vmem:[%s1479_s3 + $0x70] ss:$0 sm:$0xff] }
 0x77a   :  { %v414_v18 = vmul.f32 %v412_v17, %v412_v17 }
 0x77c   :  { %v418_v19 = vsel %vm128_vm2, %v414_v18, 0.0 }
 0x77d   :  { %419 = vadd.xlane.f32.xlu1 %v418_v19 }
 0x7e8   :  { %v417_v21 = vpop.xlane.xlu0 %416 }
 0x7e9   :  { %v421_v22 = vmul.f32 %v417_v21, %v1298_v10 }
 0x7eb   :  { %v423_v24 = vadd.f32 1e-05, %v421_v22 }
 0x7ed   :  { %1162 = vrsqrt.f32 %v423_v24  ;;  %vm431_vm12 = vweird.f32 %v423_v24 }
 0x7f0   :  { %v420_v25 = vpop.xlane.xlu1 %419 }
 0x7f1   :  { %v422_v26 = vmul.f32 %v420_v25, %v1298_v10 }
 0x7f3   :  { %v1163_v27 = vpop.eup %1162  ;;  %v424_v28 = vadd.f32 1e-05, %v422_v26 }
 0x7f4   :  { %v426_v29 = vmul.f32 %v1163_v27, %v423_v24  ;;  %vm432_vm11 = vweird.f32 %v1163_v27 }
 0x7f5   :  { %1164 = vrsqrt.f32 %v424_v28  ;;  %vm433_vm13 = vmor %vm431_vm12, %vm432_vm11  ;;  %vm441_vm15 = vweird.f32 %v424_v28 }
 0x7f6   :  { %v427_v30 = vmul.f32 %v1163_v27, %v426_v29  ;;  %v1108_v29 = vld [vmem:[%s1478_s2 + $0x90] sm:$0xff] }
 0x7f8   :  { %v428_v31 = vmul.f32 0.5, %v427_v30  ;;  %v1113_v30 = vld [vmem:[%s1478_s2 + $0xb8] sm:$0xff] }
 0x7fa   :  { %v429_v32 = vsub.f32 1.5, %v428_v31 }
 0x7fb   :  { %v1165_v33 = vpop.eup %1164 }
 0x7fc   :  { %v430_v34 = vmul.f32 %v1163_v27, %v429_v32  ;;  %v436_v35 = vmul.f32 %v1165_v33, %v424_v28  ;;  %vm442_vm14 = vweird.f32 %v1165_v33  ;;  %v1109_v28 = vld [vmem:[%s1478_s2 + $0x98] sm:$0xff] }
 0x7fd   :  { %vm443_vm0 = vmor %vm441_vm15, %vm442_vm14  ;;  %639 = vmatpush.bf16.msrb.mxu1 %v1109_v28 }
 0x7fe   :  { %v437_v36 = vmul.f32 %v1165_v33, %v436_v35  ;;  %v434_v37 = vsel %vm433_vm13, %v1163_v27, %v430_v34  ;;  %vm881_vm13 = vcmask 31744  }
 0x7ff   :  { %v445_v41 = vmul.f32 %v434_v37, %v411_v12  ;;  %v1106_v12 = vld [vmem:[%s1478_s2 + $0x80] sm:$0xff] }
 0x800   :  { %v438_v38 = vmul.f32 0.5, %v437_v36  ;;  %575 = vmatpush.bf16.msra.mxu0 %v1106_v12 }
 0x801   :  { %v449_v45 = vmul.f32 %v1135_v40, %v445_v41  ;;  %640 = vmatpush.bf16.msrb.mxu1 %v1108_v29  ;;  %v1139_v41 = vld [vmem:[%s1479_s3 + $0x80] ss:$0 sm:$0xff] }
 0x802   :  { %v439_v39 = vsub.f32 1.5, %v438_v38 }
 0x803   :  { %v453_v48 = vadd.f32 %v1136_v44, %v449_v45 }
 0x804   :  { %v440_v42 = vmul.f32 %v1165_v33, %v439_v39 }
 0x806   :  { %v444_v43 = vsel %vm443_vm0, %v1165_v33, %v440_v42  ;;  %v1112_v33 = vld [vmem:[%s1478_s2 + $0xb0] sm:$0xff] }
 0x807   :  { %v446_v46 = vmul.f32 %v444_v43, %v412_v17  ;;  %v1138_v17 = vld [vmem:[%s1479_s3 + $0x78] ss:$0 sm:$0xff]  ;;  %v1140_v43 = vld [vmem:[%s1479_s3 + $0x88] ss:$0 sm:$0xff] }
 0x809   :  { %v450_v47 = vmul.f32 %v1135_v40, %v446_v46 }
 0x80b   :  { %v454_v49 = vadd.f32 %v1136_v44, %v450_v47 }
 0x80d   :  { %v455_v50 = vpack.c.bf16 %v454_v49, %v453_v48  ;;  %v1111_v48 = vld [vmem:[%s1478_s2 + $0xa8] sm:$0xff]  ;;  %v1110_v49 = vld [vmem:[%s1478_s2 + $0xa0] sm:$0xff] }
 0x80f   :  { %1024 = vmatmul.msk.bf16.vlgmr.msra.gmra.mxu1 %vm128_vm2, %v455_v50  ;;  %v1141_v50 = vld [vmem:[%s1479_s3 + $0x90] ss:$0 sm:$0xff] }
 0x88c   :  { %v486_v51 = vpop.f32.mrf.mxu1 }
 0x88d   :  { %v487_v55 = vadd.f32 %v486_v51, %v460_v52 }
 0x894   :  { %v488_v54 = vpop.f32.mrf.mxu1 }
 0x895   :  { %v489_v56 = vadd.f32 %v488_v54, %v461_v53 }
 0x897   :  { %v493_v57 = vpack.c.bf16 %v489_v56, %v487_v55  ;;  %v1142_v56 = vld [vmem:[%s1479_s3 + $0x98] ss:$0 sm:$0xff] }
 0x899   :  { %v498_v58 = vsel %vm128_vm2, %v493_v57, 0 }
 0x89a   :  { %507 = vmatpush.bf16.xpose.msra.mxu2 %v498_v58 }
 0x8a1   :  { %1025 = vmatmul.msk.bf16.vlgmr.msra.gmra.mxu2 %vm128_vm2, %v492_v60 }
 0x8a2   :  { %689 = vmatpush.bf16.msrb.mxu2 %v1113_v30  ;;  %v1119_v30 = vld [vmem:[%s1478_s2 + $0xe8] sm:$0xff] }
 0x8a3   :  { %830 = vmatpush.bf16.msra.mxu1 %v1119_v30 }
 0x8a6   :  { %690 = vmatpush.bf16.msrb.mxu2 %v1112_v33 }
 0x8aa   :  { %691 = vmatpush.bf16.msrb.mxu2 %v1111_v48 }
 0x8ae   :  { %692 = vmatpush.bf16.msrb.mxu2 %v1110_v49 }
 0x924   :  { %v509_v61 = vpop.f32.mrf.mxu2 }
 0x925   :  { %v513_v62 = vsel %vm91_vm1, %v509_v61, -inf }
 0x926   :  { %514 = vmax.xlane.f32.xlu0 %v513_v62 }
 0x92c   :  { %v511_v63 = vpop.f32.mrf.mxu2 }
 0x93a   :  { %526 = vrot.lane.b32.xlu0 %v493_v57, %s1197_s15 }
 0x999   :  { %v515_v0 = vpop.xlane.xlu0 %514 }
 0x99a   :  { %v516_v1 = vsub.f32 %v509_v61, %v515_v0 }
 0x99c   :  { %v517_v2 = vmul.f32 1.442695, %v516_v1 }
 0x99e   :  { %1166 = vpow2.f32 %v517_v2 }
 0x9a4   :  { %v1167_v3 = vpop.eup %1166 }
 0x9a5   :  { %v519_v4 = vsel %vm91_vm1, %v1167_v3, 0.0 }
 0x9a6   :  { %520 = vadd.xlane.f32.xlu1 %v519_v4  ;;  %v1114_v4 = vld [vmem:[%s1478_s2 + $0xc0] sm:$0xff] }
 0x9ac   :  { %v527_v5 = vpop.permute.xlu0 %526 }
 0x9ad   :  { %539 = vmatpush.bf16.msra.mxu3 %v527_v5 }
 0xa19   :  { %v521_v7 = vpop.xlane.xlu1 %520 }
 0xa1a   :  { %1168 = vrcp.f32 %v521_v7 }
 0xa20   :  { %v1169_v8 = vpop.eup %1168 }
 0xa21   :  { %v523_v9 = vmul.f32 %v1169_v8, %v1167_v3  ;;  %v1115_v3 = vld [vmem:[%s1478_s2 + $0xc8] sm:$0xff] }
 0xa22   :  { %755 = vmatpush.bf16.msrb.mxu3 %v1115_v3 }
 0xa23   :  { %v524_v11 = vpack.c.bf16 %v523_v9, %v523_v9 }
 0xa25   :  { %1026 = vmatmul.msk.bf16.vlgmr.msra.gmra.mxu3 %vm91_vm1, %v524_v11 }
 0xa26   :  { %756 = vmatpush.bf16.msrb.mxu3 %v1114_v4 }
 0xaa8   :  { %v541_v13 = vpop.f32.mrf.mxu3 }
 0xaa9   :  { %v546_v14 = vpack.c.bf16 %v541_v13, %v541_v13 }
 0xaab   :  { %1035 = vmatmul.msk.bf16.vlgmr.msra.gmra.mxu0 %vm128_vm2, %v546_v14 }
 0xab0   :  { %v543_v15 = vpop.f32.mrf.mxu3 }
 0xab1   :  { %v1143_v15 = vld [vmem:[%s1479_s3 + $0xa0] ss:$0 sm:$0xff] }
 0xb28   :  { %v577_v18 = vpop.f32.mrf.mxu0 }
 0xb29   :  { %v578_v19 = vadd.f32 %v1137_v16, %v577_v18 }
 0xb2b   :  { %v582_v20 = vadd.f32 %v1138_v17, %v578_v19 }
 0xb2d   :  { %v583_v21 = vsel %vm128_vm2, %v582_v20, 0.0 }
 0xb2e   :  { %584 = vadd.xlane.f32.xlu1 %v583_v21  ;;  %v1117_v21 = vld [vmem:[%s1478_s2 + $0xd8] sm:$0xff] }
 0xb2f   :  { %794 = vmatpush.bf16.msrb.mxu0 %v1117_v21 }
 0xb30   :  { %v579_v22 = vpop.f32.mrf.mxu0 }
 0xb31   :  { %v1116_v22 = vld [vmem:[%s1478_s2 + $0xd0] sm:$0xff] }
 0xb33   :  { %795 = vmatpush.bf16.msrb.mxu0 %v1116_v22 }
 0xba1   :  { %v585_v23 = vpop.xlane.xlu1 %584 }
 0xba2   :  { %v586_v24 = vmul.f32 %v585_v23, %v1298_v10  ;;  %v1145_v23 = vld [vmem:[%s1479_s3 + $0xb0] ss:$0 sm:$0xff] }
 0xba4   :  { %v587_v25 = vsub.f32 %v582_v20, %v586_v24 }
 0xba6   :  { %v588_v26 = vmul.f32 %v587_v25, %v587_v25 }
 0xba8   :  { %v589_v27 = vsel %vm128_vm2, %v588_v26, 0.0 }
 0xba9   :  { %590 = vadd.xlane.f32.xlu2 %v589_v27 }
 0xc1c   :  { %v591_v31 = vpop.xlane.xlu2 %590 }
 0xc1d   :  { %v592_v32 = vmul.f32 %v591_v31, %v1298_v10 }
 0xc1f   :  { %v593_v34 = vadd.f32 1e-05, %v592_v32 }
 0xc21   :  { %1170 = vrsqrt.f32 %v593_v34  ;;  %vm600_vm3 = vweird.f32 %v593_v34 }
 0xc27   :  { %v1171_v35 = vpop.eup %1170 }
 0xc28   :  { %v595_v36 = vmul.f32 %v1171_v35, %v593_v34  ;;  %vm601_vm1 = vweird.f32 %v1171_v35 }
 0xc29   :  { %vm602_vm4 = vmor %vm600_vm3, %vm601_vm1 }
 0xc2a   :  { %v596_v37 = vmul.f32 %v1171_v35, %v595_v36 }
 0xc2c   :  { %v597_v38 = vmul.f32 0.5, %v596_v37  ;;  %v1118_v37 = vld [vmem:[%s1478_s2 + $0xe0] sm:$0xff] }
 0xc2d   :  { %831 = vmatpush.bf16.msra.mxu1 %v1118_v37 }
 0xc2e   :  { %v598_v39 = vsub.f32 1.5, %v597_v38  ;;  %v1146_v38 = vld [vmem:[%s1479_s3 + $0xb8] ss:$0 sm:$0xff] }
 0xc30   :  { %v599_v40 = vmul.f32 %v1171_v35, %v598_v39 }
 0xc32   :  { %v603_v42 = vsel %vm602_vm4, %v1171_v35, %v599_v40  ;;  %vm936_vm4 = vcmask 7168  }
 0xc33   :  { %v604_v44 = vmul.f32 %v603_v42, %v587_v25 }
 0xc35   :  { %v607_v45 = vmul.f32 %v1139_v41, %v604_v44 }
 0xc37   :  { %v610_v46 = vadd.f32 %v1140_v43, %v607_v45 }
 0xc39   :  { %v611_v47 = vpack.c.bf16 %v610_v46, %v610_v46 }
 0xc3b   :  { %1044 = vmatmul.msk.bf16.vlgmr.msrb.gmra.mxu1 %vm128_vm2, %v611_v47 }
 0xcb8   :  { %v642_v51 = vpop.f32.mrf.mxu1 }
 0xcb9   :  { %v643_v52 = vadd.f32 %v1141_v50, %v642_v51 }
 0xcbb   :  { %v646_v53 = vmax.f32 %v643_v52, 0.0 }
 0xcbd   :  { %v647_v54 = vpack.c.bf16 %v646_v53, %v646_v53 }
 0xcbf   :  { %1061 = vmatmul.msk.bf16.vlgmr.msrb.gmra.mxu2 %vm383_vm10, %v647_v54 }
 0xcc0   :  { %v644_v55 = vpop.f32.mrf.mxu1 }
 0xd42   :  { %v694_v57 = vpop.f32.mrf.mxu2 }
 0xd43   :  { %v695_v58 = vadd.f32 %v1142_v56, %v694_v57  ;;  %v1147_v57 = vld [vmem:[%s1479_s3 + $0xc0] ss:$0 sm:$0xff] }
 0xd45   :  { %v698_v59 = vadd.f32 %v695_v58, %v610_v46  ;;  %v885_v58 = vlaneseq }
 0xd47   :  { %v699_v60 = vsel %vm128_vm2, %v698_v59, 0.0 }
 0xd48   :  { %700 = vadd.xlane.f32.xlu1 %v699_v60 }
 0xd4a   :  { %v696_v61 = vpop.f32.mrf.mxu2 }
 0xd4b   :  { %v886_v61 = vand.u32 127, %v885_v58 }
 0xdbb   :  { %v701_v62 = vpop.xlane.xlu1 %700 }
 0xdbc   :  { %v702_v63 = vmul.f32 %v701_v62, %v1298_v10 }
 0xdbe   :  { %v703_v0 = vsub.f32 %v698_v59, %v702_v63 }
 0xdc0   :  { %v704_v1 = vmul.f32 %v703_v0, %v703_v0 }
 0xdc2   :  { %v705_v2 = vsel %vm128_vm2, %v704_v1, 0.0 }
 0xdc3   :  { %706 = vadd.xlane.f32.xlu2 %v705_v2 }
 0xe36   :  { %v707_v5 = vpop.xlane.xlu2 %706 }
 0xe37   :  { %v708_v6 = vmul.f32 %v707_v5, %v1298_v10  ;;  %v1144_v10 = vld [vmem:[%s1479_s3 + $0xa8] ss:$0 sm:$0xff]  ;;  %s1201_s3 = smov 126  }
 0xe39   :  { %v709_v7 = vadd.f32 1e-05, %v708_v6 }
 0xe3b   :  { %1172 = vrsqrt.f32 %v709_v7  ;;  %vm716_vm6 = vweird.f32 %v709_v7 }
 0xe41   :  { %v1173_v8 = vpop.eup %1172 }
 0xe42   :  { %v711_v9 = vmul.f32 %v1173_v8, %v709_v7  ;;  %vm717_vm5 = vweird.f32 %v1173_v8 }
 0xe43   :  { %vm718_vm7 = vmor %vm716_vm6, %vm717_vm5  ;;  %vm938_vm5 = vcmask 15360   ;;  %vm940_vm6 = vcmask 23552  }
 0xe44   :  { %v712_v11 = vmul.f32 %v1173_v8, %v711_v9 }
 0xe46   :  { %v713_v12 = vmul.f32 0.5, %v712_v11 }
 0xe48   :  { %v714_v13 = vsub.f32 1.5, %v713_v12 }
 0xe4a   :  { %v715_v14 = vmul.f32 %v1173_v8, %v714_v13 }
 0xe4c   :  { %v719_v16 = vsel %vm718_vm7, %v1173_v8, %v715_v14  ;;  %vm944_vm7 = vcmask 48128  }
 0xe4d   :  { %v720_v17 = vmul.f32 %v719_v16, %v703_v0 }
 0xe4f   :  { %v723_v18 = vmul.f32 %v1143_v15, %v720_v17 }
 0xe51   :  { %v726_v19 = vadd.f32 %v1144_v10, %v723_v18 }
 0xe53   :  { %v727_v20 = vpack.c.bf16 %v726_v19, %v726_v19 }
 0xe55   :  { %1070 = vmatmul.msk.bf16.vlgmr.msrb.gmra.mxu3 %vm128_vm2, %v727_v20  ;;  %v915_v20 = vstv %s905_s24 }
 0xed8   :  { %v758_v24 = vpop.f32.mrf.mxu3 }
 0xed9   :  { %v759_v25 = vadd.f32 %v1145_v23, %v758_v24 }
 0xedb   :  { %v857_v26 = vsel %vm856_vm8, %v759_v25, -inf  ;;  %v762_v27 = vmax.f32 %v759_v25, 0.0 }
 0xedc   :  { %858 = vmax.xlane.f32.xlu1 %v857_v26 }
 0xedd   :  { %v763_v28 = vpack.c.bf16 %v762_v27, %v762_v27 }
 0xedf   :  { %771 = vrot.lane.b32.xlu0 %v763_v28, %s1200_s16 }
 0xee0   :  { %v760_v29 = vpop.f32.mrf.mxu3 }
 0xee1   :  { %v913_v29 = vstv %s1089_s0 }
 0xf4f   :  { %v859_v31 = vpop.xlane.xlu1 %858 }
 0xf50   :  { %v860_v32 = vsub.f32 %v759_v25, %v859_v31 }
 0xf51   :  { %v772_v33 = vpop.permute.xlu0 %771 }
 0xf52   :  { %v861_v34 = vmul.f32 1.442695, %v860_v32  ;;  %1079 = vmatmul.msk.bf16.vlgmr.msrb.gmra.mxu0 %vm128_vm2, %v772_v33 }
 0xf54   :  { %1174 = vpow2.f32 %v861_v34 }
 0xf5a   :  { %v1175_v35 = vpop.eup %1174 }
 0xf5b   :  { %v863_v36 = vsel %vm856_vm8, %v1175_v35, 0.0 }
 0xf5c   :  { %864 = vadd.xlane.f32.xlu2 %v863_v36 }
 0xfcf   :  { %v865_v39 = vpop.xlane.xlu2 %864  ;;  %v797_v40 = vpop.f32.mrf.mxu0 }
 0xfd0   :  { %1176 = vrcp.f32 %v865_v39  ;;  %v798_v41 = vadd.f32 %v1146_v38, %v797_v40  ;;  %v877_v48 = vand.u32 2147483648, %v865_v39  ;;  %v875_v50 = vand.u32 2147483647, %v865_v39 }
 0xfd1   :  { %vm871_vm10 = vweird.f32 %v865_v39 }
 0xfd2   :  { %v801_v42 = vmax.f32 %v798_v41, 0.0  ;;  %v878_v52 = vor.u32 1.1754944e-38, %v877_v48  ;;  %vm876_vm12 = vcmp.eq.f32.partialorder %v875_v50, 8.507059e+37 }
 0xfd4   :  { %v802_v43 = vpack.c.bf16 %v801_v42, %v801_v42 }
 0xfd6   :  { %v1177_v44 = vpop.eup %1176  ;;  %1088 = vmatmul.msk.bf16.vlgmr.msra.gmra.mxu1 %vm128_vm2, %v802_v43 }
 0xfd7   :  { %v867_v45 = vmul.f32 %v1177_v44, %v865_v39  ;;  %v799_v46 = vpop.f32.mrf.mxu0  ;;  %vm872_vm9 = vweird.f32 %v1177_v44 }
 0xfd8   :  { %vm873_vm11 = vmor %vm871_vm10, %vm872_vm9 }
 0xfd9   :  { %v868_v47 = vsub.f32 1.0, %v867_v45 }
 0xfdb   :  { %v869_v49 = vmul.f32 %v1177_v44, %v868_v47 }
 0xfdd   :  { %v870_v51 = vadd.f32 %v1177_v44, %v869_v49 }
 0xfdf   :  { %v874_v53 = vsel %vm873_vm11, %v1177_v44, %v870_v51 }
 0xfe0   :  { %v879_v54 = vsel %vm876_vm12, %v878_v52, %v874_v53 }
 0xfe1   :  { %v880_v55 = vmul.f32 %v1175_v35, %v879_v54 }
 0xfe3   :  { %v882_v56 = vsel %vm881_vm13, %v880_v55, -inf }
 0xfe4   :  { %883 = vmax.xlane.f32.xlu0 %v882_v56 }
0x1053   :  { %v833_v59 = vpop.f32.mrf.mxu1 }
0x1054   :  { %v834_v60 = vadd.f32 %v1147_v57, %v833_v59 }
0x1056   :  { %v837_v62 = vsub.f32 0.0, %v834_v60 }
0x1057   :  { %v1466_v63 = vpop.xlane.xlu0 %883 }
0x1058   :  { %v838_v0 = vmul.f32 1.442695, %v837_v62  ;;  %vm887_vm2 = vcmp.eq.f32.partialorder %v880_v55, %v1466_v63 }
0x1059   :  { %v888_v1 = vsel %vm887_vm2, %v886_v61, 1000000 }
0x105a   :  { %1178 = vpow2.f32 %v838_v0  ;;  %v889_v2 = vsel %vm881_vm13, %v888_v1, 2147483647 }
0x105b   :  { %v835_v3 = vpop.f32.mrf.mxu1  ;;  %v891_v4 = vshra.s32 %v889_v2, 16  ;;  %v890_v19 = vand.u32 65535, %v889_v2 }
0x105d   :  { %v893_v5 = vcvt.s32.f32 %v891_v4  ;;  %v892_v27 = vcvt.s32.f32 %v890_v19 }
0x105f   :  { %894 = vmin.xlane.f32.xlu1 %v893_v5 }
0x1060   :  { %v1179_v6 = vpop.eup %1178 }
0x1061   :  { %v840_v7 = vadd.f32 1.0, %v1179_v6 }
0x1063   :  { %1180 = vrcp.f32 %v840_v7  ;;  %v852_v12 = vand.u32 2147483648, %v840_v7  ;;  %v850_v14 = vand.u32 2147483647, %v840_v7  ;;  %vm846_vm15 = vweird.f32 %v840_v7 }
0x1065   :  { %v853_v16 = vor.u32 1.1754944e-38, %v852_v12  ;;  %vm851_vm1 = vcmp.eq.f32.partialorder %v850_v14, 8.507059e+37 }
0x1069   :  { %v1181_v8 = vpop.eup %1180 }
0x106a   :  { %v842_v9 = vmul.f32 %v1181_v8, %v840_v7  ;;  %vm847_vm14 = vweird.f32 %v1181_v8 }
0x106b   :  { %vm848_vm0 = vmor %vm846_vm15, %vm847_vm14 }
0x106c   :  { %v843_v11 = vsub.f32 1.0, %v842_v9 }
0x106e   :  { %v844_v13 = vmul.f32 %v1181_v8, %v843_v11 }
0x1070   :  { %v845_v15 = vadd.f32 %v1181_v8, %v844_v13 }
0x1072   :  { %v849_v17 = vsel %vm848_vm0, %v1181_v8, %v845_v15 }
0x1073   :  { %v854_v10 = vsel %vm851_vm1, %v853_v16, %v849_v17 }
0x1074   :  { %v907_v18 = vmul.f32 0.5, %v854_v10 }
0x1076   :  { %909 = vrot.lane.b32.xlu2 %v907_v18, %s1201_s3 }
0x10d0   :  { %v910_v21 = vpop.permute.xlu2 %909 }
0x10d1   :  { %v912_v22 = vsub.f32 %v854_v10, %v910_v21  ;;  %v917_v23 = vadd.f32 %v910_v21, %v854_v10 }
0x10d2   :  { %v895_v24 = vpop.xlane.xlu1 %894 }
0x10d3   :  { %v916_v25 = vmul.f32 %v915_v20, %v912_v22  ;;  %v919_v26 = vmul.f32 %v917_v23, %v915_v20  ;;  %vm896_vm3 = vcmp.eq.f32.partialorder %v893_v5, %v895_v24  ;;  %v918_v30 = vmul.f32 %v917_v23, %v913_v29 }
0x10d4   :  { %v897_v28 = vsel %vm896_vm3, %v892_v27, inf  ;;  %v914_v31 = vmul.f32 %v913_v29, %v912_v22  ;;  %v901_v34 = vcvt.f32.s32 %v895_v24 }
0x10d5   :  { %933 = vrot.lane.b32.xlu0 %v919_v26, %s1202_s25  ;;  %925 = vrot.lane.b32.xlu2 %v916_v25, %s1203_s26 }
0x10d6   :  { %898 = vmin.xlane.f32.xlu1 %v897_v28  ;;  %v902_v36 = vshll.u32 %v901_v34, 16 }
0x10dd   :  { %929 = vrot.lane.b32.xlu2 %v918_v30, %s1202_s25 }
0x10ef   :  { %921 = vrot.lane.b32.xlu1 %v914_v31, %s1203_s26 }
0x112f   :  { %v926_v32 = vpop.permute.xlu2 %925 }
0x1137   :  { %v930_v40 = vpop.permute.xlu2 %929 }
0x1147   :  { %v934_v42 = vpop.permute.xlu0 %933 }
0x1149   :  { %v899_v33 = vpop.xlane.xlu1 %898 }
0x114a   :  { %v900_v35 = vcvt.f32.s32 %v899_v33 }
0x114c   :  { %v903_v37 = vadd.s32 %v902_v36, %v900_v35 }
0x114e   :  { %v904_v43 = vcvt.s32.f32 %v903_v37 }
0x1161   :  { %v922_v38 = vpop.permute.xlu1 %921 }
0x1162   :  { %v937_v39 = vsel %vm936_vm4, %v1466_v63, %v922_v38 }
0x1163   :  { %v939_v41 = vsel %vm938_vm5, %v937_v39, %v926_v32 }
0x1164   :  { %v941_v44 = vsel %vm940_vm6, %v939_v41, %v930_v40 }
0x1165   :  { %v942_v45 = vsel %vm881_vm13, %v941_v44, %v934_v42 }
0x1166   :  { %v943_v46 = vsel %vm856_vm8, %v942_v45, %v904_v43 }
0x1167   :  { %v945_v47 = vsel %vm944_vm7, %v943_v46, 0.0 }
0x1168   :  { %946 = vst [vmem:[%s1480_s4] sm:$0xff] %v945_v47 }
0x1169   :  { %951 = vsyncpa [#allocation3], 1 }

</bundles_post_ra>
